<compile_context>
chip_gen: v7x
topology: tpu7x:2x2x1
jax: 0.10.0
libtpu: 0.0.40
codegen_flags: <defaults>
</compile_context>

<pallas_src>
import jax
import jax.numpy as jnp
from jax.experimental import pallas as pl
from jax.experimental.pallas import tpu as pltpu


def _ctc_kernel(x_ref, wih0t_ref, whh0t_ref, b0_ref, w1cat_ref, b1_ref,
                out_ref, hseq_ref):
    """One batch block: 2-layer LSTM over time, softmax over positions, final bmm.

    x_ref:      [BB, T, D]   input block
    wih0t_ref:  [D, 4H]      layer-0 input weights, pre-transposed
    whh0t_ref:  [H, 4H]      layer-0 recurrent weights, pre-transposed
    b0_ref:     [1, 4H]      layer-0 bias (b_ih + b_hh)
    w1cat_ref:  [2H, 4H]     layer-1 [W_ih.T ; W_hh.T] fused
    b1_ref:     [1, 4H]      layer-1 bias (b_ih + b_hh)
    out_ref:    [BB, L, D]   L = H - 1 (out_seq_len)
    hseq_ref:   [BB, T, H]   scratch: layer-2 hidden states (batch-major layout)
    """
    BB, T, D = x_ref.shape
    G = wih0t_ref.shape[1]
    H = G // 4

    x = x_ref[...]                                    # [BB, T, D]
    wih0t = wih0t_ref[...].astype(jnp.float32)        # [D, 4H]
    whh0t = whh0t_ref[...].astype(jnp.float32)        # [H, 4H]
    w1cat = w1cat_ref[...].astype(jnp.float32)        # [2H, 4H]
    b0 = b0_ref[...].astype(jnp.float32)              # [1, 4H]
    # Hoisted bias broadcast (JAX does not CSE broadcast_in_dim inside the loop).
    b1 = jnp.broadcast_to(b1_ref[...].astype(jnp.float32), (BB, G))

    # ---- Hoisted layer-0 input projection: one [BB*T, D] x [D, 4H] matmul ----
    x2d = x.reshape(BB * T, D)
    gin0 = (jnp.dot(x2d, wih0t, preferred_element_type=jnp.float32)
            + b0).reshape(BB, T, G)                   # [BB, T, 4H]

    def gate_act(g):
        # PyTorch gate order i, f, g, o.  (H is small -> within-vreg lane selects.)
        i = jax.nn.sigmoid(g[:, 0 * H:1 * H])
        f = jax.nn.sigmoid(g[:, 1 * H:2 * H])
        gg = jnp.tanh(g[:, 2 * H:3 * H])
        o = jax.nn.sigmoid(g[:, 3 * H:4 * H])
        return i, f, gg, o

    zeros = jnp.zeros((BB, H), jnp.float32)
    h0 = c0 = h1 = c1 = zeros

    # Fully-unrolled time loop (T is static): only 2 small matmuls per step sit
    # on the serial recurrence, and the LLO scheduler can overlap layer-0 of
    # step t+1 with layer-1 elementwise/EUP work of step t.
    for t in range(T):
        # Layer 0: recurrent matmul only (input projection precomputed above).
        g0 = gin0[:, t, :] + jnp.dot(h0, whh0t, preferred_element_type=jnp.float32)
        i0, f0, gg0, o0 = gate_act(g0)
        c0 = f0 * c0 + i0 * gg0
        h0 = o0 * jnp.tanh(c0)

        # Layer 1: both matmuls fused:  [h0 ; h1] @ [W_ih1.T ; W_hh1.T]
        g1 = jnp.dot(jnp.concatenate([h0, h1], axis=1), w1cat,
                     preferred_element_type=jnp.float32) + b1
        i1, f1, gg1, o1 = gate_act(g1)
        c1 = f1 * c1 + i1 * gg1
        h1 = o1 * jnp.tanh(c1)

        hseq_ref[:, t, :] = h1                        # [BB, H], batch-major store

    # ---- Softmax over positions (last dim), drop blank column 0 ----
    hs = hseq_ref[...]                                # [BB, T, H], no transpose needed
    m = jnp.max(hs, axis=-1, keepdims=True)
    e = jnp.exp(hs - m)
    denom = jnp.sum(e, axis=-1, keepdims=True)
    r = pl.reciprocal(denom, approx=True)             # EUP slot (nearly free)
    r = r * (2.0 - denom * r)                         # one Newton step -> f32 accuracy
    p_pos = (e * r)[:, :, 1:]                         # [BB, T, L]

    # bmm(p_pos.transpose(1, 2), x) == einsum('btl,btd->bld')
    # NOTE: on v6e/v7x this einsum and the hoisted projection can take bf16
    # operands (keep f32 accumulation); kept f32 here for tight reference check.
    out = jnp.einsum('btl,btd->bld', p_pos, x.astype(jnp.float32),
                     preferred_element_type=jnp.float32)
    out_ref[...] = out.astype(out_ref.dtype)


def ctc_module_forward(x, params, *, batch_block=1):
    """Pallas-backed forward of CTCModule."""
    B, T, D = x.shape
    wih0, whh0, b0, wih1, whh1, b1 = (params['wih0'], params['whh0'], params['b0'],
                                      params['wih1'], params['whh1'], params['b1'])
    H = wih0.shape[0] // 4
    L = H - 1
    G = 4 * H

    # Pre-transpose / fuse weights once outside the kernel (keeps XLU work off
    # the per-timestep critical path).
    wih0_t = jnp.transpose(wih0)                                       # [D, 4H]
    whh0_t = jnp.transpose(whh0)                                       # [H, 4H]
    w1cat_t = jnp.concatenate([jnp.transpose(wih1), jnp.transpose(whh1)],
                              axis=0)                                  # [2H, 4H]

    BB = batch_block
    assert B % BB == 0, "batch_block must divide batch size"
    grid = (B // BB,)

    # NOTE: for very long T on v7x (64 MiB VMEM), fuse softmax + per-step
    # outer-product accumulation into the loop to drop the (BB,T,H) scratch and
    # tile T; unnecessary at these sizes.
    return pl.pallas_call(
        _ctc_kernel,
        out_shape=jax.ShapeDtypeStruct((B, L, D), x.dtype),
        grid=grid,
        in_specs=[
            pl.BlockSpec((BB, T, D), lambda b: (b, 0, 0)),     # x: streamed per batch block
            pl.BlockSpec((D, G), lambda b: (0, 0)),            # weights: fetched once,
            pl.BlockSpec((H, G), lambda b: (0, 0)),            # block index constant so
            pl.BlockSpec((1, G), lambda b: (0, 0)),            # no re-DMA across grid steps
            pl.BlockSpec((2 * H, G), lambda b: (0, 0)),
            pl.BlockSpec((1, G), lambda b: (0, 0)),
        ],
        out_specs=pl.BlockSpec((BB, L, D), lambda b: (b, 0, 0)),
        scratch_shapes=[pltpu.VMEM((BB, T, H), jnp.float32)],
        compiler_params=pltpu.CompilerParams(
            dimension_semantics=("parallel",),     # lets v7x shard batches over 2 TCs
            vmem_limit_bytes=32 * 1024 * 1024,     # explicit budget, safe on v5e/v6e/v7x
        ),
    )(x, wih0_t, whh0_t, b0, w1cat_t, b1)


# ----------------------- pure-JAX reference (for checking) -----------------------
def _lstm_layer_ref(x, wih, whh, b):
    B, T, D = x.shape
    H = wih.shape[0] // 4

    def step(carry, xt):
        h, c = carry
        g = xt @ wih.T + h @ whh.T + b
        i = jax.nn.sigmoid(g[:, 0:H])
        f = jax.nn.sigmoid(g[:, H:2 * H])
        gg = jnp.tanh(g[:, 2 * H:3 * H])
        o = jax.nn.sigmoid(g[:, 3 * H:4 * H])
        c = f * c + i * gg
        h = o * jnp.tanh(c)
        return (h, c), h

    init = (jnp.zeros((B, H), jnp.float32), jnp.zeros((B, H), jnp.float32))
    _, hs = jax.lax.scan(step, init, jnp.transpose(x, (1, 0, 2)))
    return jnp.transpose(hs, (1, 0, 2))


def ctc_module_forward_ref(x, params):
    h = _lstm_layer_ref(x, params['wih0'], params['whh0'], params['b0'])
    h = _lstm_layer_ref(h, params['wih1'], params['whh1'], params['b1'])
    p = jax.nn.softmax(h, axis=-1)
    return jnp.einsum('btl,btd->bld', p[:, :, 1:], x)


def init_params(key, in_dim, out_seq_len):
    """Synthetic params matching nn.LSTM(in_dim, out_seq_len+1, num_layers=2).

    Biases are pre-folded (b_ih + b_hh) into a single [1, 4H] bias per layer.
    """
    H = out_seq_len + 1
    k = 1.0 / jnp.sqrt(jnp.float32(H))
    keys = jax.random.split(key, 6)
    u = lambda kk, shape: jax.random.uniform(kk, shape, jnp.float32, -k, k)
    return {
        'wih0': u(keys[0], (4 * H, in_dim)),
        'whh0': u(keys[1], (4 * H, H)),
        'b0':   u(keys[2], (1, 4 * H)),
        'wih1': u(keys[3], (4 * H, H)),
        'whh1': u(keys[4], (4 * H, H)),
        'b1':   u(keys[5], (1, 4 * H)),
    }


if __name__ == "__main__":
    B, T_in, in_dim, out_seq_len = 2, 8, 16, 6

    key = jax.random.PRNGKey(0)
    kx, kp = jax.random.split(key)
    x = jax.random.normal(kx, (B, T_in, in_dim), jnp.float32)
    params = init_params(kp, in_dim, out_seq_len)

    out = ctc_module_forward(x, params, batch_block=1)
    out = jax.block_until_ready(out)

    ref = jax.block_until_ready(ctc_module_forward_ref(x, params))
    assert out.shape == (B, out_seq_len, in_dim), out.shape
    err = float(jnp.max(jnp.abs(out - ref)))
    assert jnp.allclose(out, ref, atol=2e-4, rtol=2e-4), err

    print("KERNEL_OK")
</pallas_src>

<mosaic_0001>
module attributes {stable_mosaic.version = 11 : i64} {
  func.func @_ctc_kernel(%arg0: i32, %arg1: memref<1x8x16xf32, #tpu.memory_space<vmem>>, %arg2: memref<16x28xf32, #tpu.memory_space<vmem>>, %arg3: memref<7x28xf32, #tpu.memory_space<vmem>>, %arg4: memref<1x28xf32, #tpu.memory_space<vmem>>, %arg5: memref<14x28xf32, #tpu.memory_space<vmem>>, %arg6: memref<1x28xf32, #tpu.memory_space<vmem>>, %arg7: memref<1x6x16xf32, #tpu.memory_space<vmem>>, %arg8: memref<1x8x7xf32, #tpu.memory_space<vmem>>) attributes {dimension_semantics = [#tpu.dimension_semantics<parallel>], iteration_bounds = array<i64: 2>, scalar_prefetch = 0 : i64, scratch_operands = 1 : i64, tpu.core_type = #tpu.core_type<tc>, window_params = [{transform_indices = @transform_0, window_bounds = array<i64: 1, 8, 16>}, {pipeline_mode = #tpu.pipeline_mode<synchronous>, transform_indices = @transform_1, window_bounds = array<i64: 16, 28>}, {pipeline_mode = #tpu.pipeline_mode<synchronous>, transform_indices = @transform_2, window_bounds = array<i64: 7, 28>}, {pipeline_mode = #tpu.pipeline_mode<synchronous>, transform_indices = @transform_3, window_bounds = array<i64: 1, 28>}, {pipeline_mode = #tpu.pipeline_mode<synchronous>, transform_indices = @transform_4, window_bounds = array<i64: 14, 28>}, {pipeline_mode = #tpu.pipeline_mode<synchronous>, transform_indices = @transform_5, window_bounds = array<i64: 1, 28>}, {transform_indices = @transform_6, window_bounds = array<i64: 1, 6, 16>}]} {
    %c0 = arith.constant 0 : index
    %c0_0 = arith.constant 0 : index
    %c0_1 = arith.constant 0 : index
    %0 = vector.load %arg1[%c0, %c0_0, %c0_1] : memref<1x8x16xf32, #tpu.memory_space<vmem>>, vector<1x8x16xf32>
    %c0_2 = arith.constant 0 : index
    %c0_3 = arith.constant 0 : index
    %1 = vector.load %arg2[%c0_2, %c0_3] : memref<16x28xf32, #tpu.memory_space<vmem>>, vector<16x28xf32>
    %c0_4 = arith.constant 0 : index
    %c0_5 = arith.constant 0 : index
    %2 = vector.load %arg3[%c0_4, %c0_5] : memref<7x28xf32, #tpu.memory_space<vmem>>, vector<7x28xf32>
    %c0_6 = arith.constant 0 : index
    %c0_7 = arith.constant 0 : index
    %3 = vector.load %arg5[%c0_6, %c0_7] : memref<14x28xf32, #tpu.memory_space<vmem>>, vector<14x28xf32>
    %c0_8 = arith.constant 0 : index
    %c0_9 = arith.constant 0 : index
    %4 = vector.load %arg4[%c0_8, %c0_9] : memref<1x28xf32, #tpu.memory_space<vmem>>, vector<1x28xf32>
    %c0_10 = arith.constant 0 : index
    %c0_11 = arith.constant 0 : index
    %5 = vector.load %arg6[%c0_10, %c0_11] : memref<1x28xf32, #tpu.memory_space<vmem>>, vector<1x28xf32>
    %6 = vector.shape_cast %0 : vector<1x8x16xf32> to vector<8x16xf32>
    %cst = arith.constant dense<0.000000e+00> : vector<8x28xf32>
    %7 = tpu.matmul %6, %1, %cst {dimension_numbers = #tpu.dot_dimension_numbers<[1], [0], [0], [1], [0, 0, 1, 1], [], []>} : vector<8x16xf32>, vector<16x28xf32>, vector<8x28xf32> -> vector<8x28xf32>
    %8 = vector.broadcast %4 : vector<1x28xf32> to vector<8x28xf32>
    %9 = arith.addf %7, %8 : vector<8x28xf32>
    %10 = vector.shape_cast %9 : vector<8x28xf32> to vector<1x8x28xf32>
    %cst_12 = arith.constant 0.000000e+00 : f32
    %11 = vector.broadcast %cst_12 : f32 to vector<1x7xf32>
    %12 = vector.extract_strided_slice %10 {offsets = [0, 0, 0], sizes = [1, 1, 28], strides = [1, 1, 1]} : vector<1x8x28xf32> to vector<1x1x28xf32>
    %13 = vector.shape_cast %12 : vector<1x1x28xf32> to vector<1x28xf32>
    %cst_13 = arith.constant dense<0.000000e+00> : vector<1x28xf32>
    %14 = tpu.matmul %11, %2, %cst_13 {dimension_numbers = #tpu.dot_dimension_numbers<[1], [0], [0], [1], [0, 0, 1, 1], [], []>} : vector<1x7xf32>, vector<7x28xf32>, vector<1x28xf32> -> vector<1x28xf32>
    %15 = arith.addf %13, %14 : vector<1x28xf32>
    %16 = vector.extract_strided_slice %15 {offsets = [0, 0], sizes = [1, 7], strides = [1, 1]} : vector<1x28xf32> to vector<1x7xf32>
    %17 = arith.negf %16 : vector<1x7xf32>
    %18 = math.exp %17 : vector<1x7xf32>
    %cst_14 = arith.constant 1.000000e+00 : f32
    %19 = vector.broadcast %cst_14 : f32 to vector<1x7xf32>
    %20 = arith.addf %19, %18 : vector<1x7xf32>
    %21 = arith.divf %19, %20 : vector<1x7xf32>
    %22 = vector.extract_strided_slice %15 {offsets = [0, 7], sizes = [1, 7], strides = [1, 1]} : vector<1x28xf32> to vector<1x7xf32>
    %23 = arith.negf %22 : vector<1x7xf32>
    %24 = math.exp %23 : vector<1x7xf32>
    %cst_15 = arith.constant 1.000000e+00 : f32
    %25 = vector.broadcast %cst_15 : f32 to vector<1x7xf32>
    %26 = arith.addf %25, %24 : vector<1x7xf32>
    %27 = arith.divf %25, %26 : vector<1x7xf32>
    %28 = vector.extract_strided_slice %15 {offsets = [0, 14], sizes = [1, 7], strides = [1, 1]} : vector<1x28xf32> to vector<1x7xf32>
    %29 = math.tanh %28 : vector<1x7xf32>
    %30 = vector.extract_strided_slice %15 {offsets = [0, 21], sizes = [1, 7], strides = [1, 1]} : vector<1x28xf32> to vector<1x7xf32>
    %31 = arith.negf %30 : vector<1x7xf32>
    %32 = math.exp %31 : vector<1x7xf32>
    %cst_16 = arith.constant 1.000000e+00 : f32
    %33 = vector.broadcast %cst_16 : f32 to vector<1x7xf32>
    %34 = arith.addf %33, %32 : vector<1x7xf32>
    %35 = arith.divf %33, %34 : vector<1x7xf32>
    %36 = arith.mulf %27, %11 : vector<1x7xf32>
    %37 = arith.mulf %21, %29 : vector<1x7xf32>
    %38 = arith.addf %36, %37 : vector<1x7xf32>
    %39 = math.tanh %38 : vector<1x7xf32>
    %40 = arith.mulf %35, %39 : vector<1x7xf32>
    %41 = tpu.concatenate %40, %11 in 1 : vector<1x7xf32>, vector<1x7xf32> -> vector<1x14xf32>
    %cst_17 = arith.constant dense<0.000000e+00> : vector<1x28xf32>
    %42 = tpu.matmul %41, %3, %cst_17 {dimension_numbers = #tpu.dot_dimension_numbers<[1], [0], [0], [1], [0, 0, 1, 1], [], []>} : vector<1x14xf32>, vector<14x28xf32>, vector<1x28xf32> -> vector<1x28xf32>
    %43 = arith.addf %42, %5 : vector<1x28xf32>
    %44 = vector.extract_strided_slice %43 {offsets = [0, 0], sizes = [1, 7], strides = [1, 1]} : vector<1x28xf32> to vector<1x7xf32>
    %45 = arith.negf %44 : vector<1x7xf32>
    %46 = math.exp %45 : vector<1x7xf32>
    %cst_18 = arith.constant 1.000000e+00 : f32
    %47 = vector.broadcast %cst_18 : f32 to vector<1x7xf32>
    %48 = arith.addf %47, %46 : vector<1x7xf32>
    %49 = arith.divf %47, %48 : vector<1x7xf32>
    %50 = vector.extract_strided_slice %43 {offsets = [0, 7], sizes = [1, 7], strides = [1, 1]} : vector<1x28xf32> to vector<1x7xf32>
    %51 = arith.negf %50 : vector<1x7xf32>
    %52 = math.exp %51 : vector<1x7xf32>
    %cst_19 = arith.constant 1.000000e+00 : f32
    %53 = vector.broadcast %cst_19 : f32 to vector<1x7xf32>
    %54 = arith.addf %53, %52 : vector<1x7xf32>
    %55 = arith.divf %53, %54 : vector<1x7xf32>
    %56 = vector.extract_strided_slice %43 {offsets = [0, 14], sizes = [1, 7], strides = [1, 1]} : vector<1x28xf32> to vector<1x7xf32>
    %57 = math.tanh %56 : vector<1x7xf32>
    %58 = vector.extract_strided_slice %43 {offsets = [0, 21], sizes = [1, 7], strides = [1, 1]} : vector<1x28xf32> to vector<1x7xf32>
    %59 = arith.negf %58 : vector<1x7xf32>
    %60 = math.exp %59 : vector<1x7xf32>
    %cst_20 = arith.constant 1.000000e+00 : f32
    %61 = vector.broadcast %cst_20 : f32 to vector<1x7xf32>
    %62 = arith.addf %61, %60 : vector<1x7xf32>
    %63 = arith.divf %61, %62 : vector<1x7xf32>
    %64 = arith.mulf %55, %11 : vector<1x7xf32>
    %65 = arith.mulf %49, %57 : vector<1x7xf32>
    %66 = arith.addf %64, %65 : vector<1x7xf32>
    %67 = math.tanh %66 : vector<1x7xf32>
    %68 = arith.mulf %63, %67 : vector<1x7xf32>
    %c0_21 = arith.constant 0 : index
    %c0_22 = arith.constant 0 : index
    %c0_23 = arith.constant 0 : index
    %69 = vector.load %arg8[%c0_21, %c0_22, %c0_23] : memref<1x8x7xf32, #tpu.memory_space<vmem>>, vector<1x1x7xf32>
    %70 = vector.shape_cast %69 : vector<1x1x7xf32> to vector<1x7xf32>
    %71 = vector.shape_cast %68 : vector<1x7xf32> to vector<1x1x7xf32>
    tpu.vector_store %arg8[%c0_21, %c0_22, %c0_23], %71 {strides = array<i32>} : memref<1x8x7xf32, #tpu.memory_space<vmem>>, vector<1x1x7xf32>,
    %72 = vector.extract_strided_slice %10 {offsets = [0, 1, 0], sizes = [1, 1, 28], strides = [1, 1, 1]} : vector<1x8x28xf32> to vector<1x1x28xf32>
    %73 = vector.shape_cast %72 : vector<1x1x28xf32> to vector<1x28xf32>
    %cst_24 = arith.constant dense<0.000000e+00> : vector<1x28xf32>
    %74 = tpu.matmul %40, %2, %cst_24 {dimension_numbers = #tpu.dot_dimension_numbers<[1], [0], [0], [1], [0, 0, 1, 1], [], []>} : vector<1x7xf32>, vector<7x28xf32>, vector<1x28xf32> -> vector<1x28xf32>
    %75 = arith.addf %73, %74 : vector<1x28xf32>
    %76 = vector.extract_strided_slice %75 {offsets = [0, 0], sizes = [1, 7], strides = [1, 1]} : vector<1x28xf32> to vector<1x7xf32>
    %77 = arith.negf %76 : vector<1x7xf32>
    %78 = math.exp %77 : vector<1x7xf32>
    %cst_25 = arith.constant 1.000000e+00 : f32
    %79 = vector.broadcast %cst_25 : f32 to vector<1x7xf32>
    %80 = arith.addf %79, %78 : vector<1x7xf32>
    %81 = arith.divf %79, %80 : vector<1x7xf32>
    %82 = vector.extract_strided_slice %75 {offsets = [0, 7], sizes = [1, 7], strides = [1, 1]} : vector<1x28xf32> to vector<1x7xf32>
    %83 = arith.negf %82 : vector<1x7xf32>
    %84 = math.exp %83 : vector<1x7xf32>
    %cst_26 = arith.constant 1.000000e+00 : f32
    %85 = vector.broadcast %cst_26 : f32 to vector<1x7xf32>
    %86 = arith.addf %85, %84 : vector<1x7xf32>
    %87 = arith.divf %85, %86 : vector<1x7xf32>
    %88 = vector.extract_strided_slice %75 {offsets = [0, 14], sizes = [1, 7], strides = [1, 1]} : vector<1x28xf32> to vector<1x7xf32>
    %89 = math.tanh %88 : vector<1x7xf32>
    %90 = vector.extract_strided_slice %75 {offsets = [0, 21], sizes = [1, 7], strides = [1, 1]} : vector<1x28xf32> to vector<1x7xf32>
    %91 = arith.negf %90 : vector<1x7xf32>
    %92 = math.exp %91 : vector<1x7xf32>
    %cst_27 = arith.constant 1.000000e+00 : f32
    %93 = vector.broadcast %cst_27 : f32 to vector<1x7xf32>
    %94 = arith.addf %93, %92 : vector<1x7xf32>
    %95 = arith.divf %93, %94 : vector<1x7xf32>
    %96 = arith.mulf %87, %38 : vector<1x7xf32>
    %97 = arith.mulf %81, %89 : vector<1x7xf32>
    %98 = arith.addf %96, %97 : vector<1x7xf32>
    %99 = math.tanh %98 : vector<1x7xf32>
    %100 = arith.mulf %95, %99 : vector<1x7xf32>
    %101 = tpu.concatenate %100, %68 in 1 : vector<1x7xf32>, vector<1x7xf32> -> vector<1x14xf32>
    %cst_28 = arith.constant dense<0.000000e+00> : vector<1x28xf32>
    %102 = tpu.matmul %101, %3, %cst_28 {dimension_numbers = #tpu.dot_dimension_numbers<[1], [0], [0], [1], [0, 0, 1, 1], [], []>} : vector<1x14xf32>, vector<14x28xf32>, vector<1x28xf32> -> vector<1x28xf32>
    %103 = arith.addf %102, %5 : vector<1x28xf32>
    %104 = vector.extract_strided_slice %103 {offsets = [0, 0], sizes = [1, 7], strides = [1, 1]} : vector<1x28xf32> to vector<1x7xf32>
    %105 = arith.negf %104 : vector<1x7xf32>
    %106 = math.exp %105 : vector<1x7xf32>
    %cst_29 = arith.constant 1.000000e+00 : f32
    %107 = vector.broadcast %cst_29 : f32 to vector<1x7xf32>
    %108 = arith.addf %107, %106 : vector<1x7xf32>
    %109 = arith.divf %107, %108 : vector<1x7xf32>
    %110 = vector.extract_strided_slice %103 {offsets = [0, 7], sizes = [1, 7], strides = [1, 1]} : vector<1x28xf32> to vector<1x7xf32>
    %111 = arith.negf %110 : vector<1x7xf32>
    %112 = math.exp %111 : vector<1x7xf32>
    %cst_30 = arith.constant 1.000000e+00 : f32
    %113 = vector.broadcast %cst_30 : f32 to vector<1x7xf32>
    %114 = arith.addf %113, %112 : vector<1x7xf32>
    %115 = arith.divf %113, %114 : vector<1x7xf32>
    %116 = vector.extract_strided_slice %103 {offsets = [0, 14], sizes = [1, 7], strides = [1, 1]} : vector<1x28xf32> to vector<1x7xf32>
    %117 = math.tanh %116 : vector<1x7xf32>
    %118 = vector.extract_strided_slice %103 {offsets = [0, 21], sizes = [1, 7], strides = [1, 1]} : vector<1x28xf32> to vector<1x7xf32>
    %119 = arith.negf %118 : vector<1x7xf32>
    %120 = math.exp %119 : vector<1x7xf32>
    %cst_31 = arith.constant 1.000000e+00 : f32
    %121 = vector.broadcast %cst_31 : f32 to vector<1x7xf32>
    %122 = arith.addf %121, %120 : vector<1x7xf32>
    %123 = arith.divf %121, %122 : vector<1x7xf32>
    %124 = arith.mulf %115, %66 : vector<1x7xf32>
    %125 = arith.mulf %109, %117 : vector<1x7xf32>
    %126 = arith.addf %124, %125 : vector<1x7xf32>
    %127 = math.tanh %126 : vector<1x7xf32>
    %128 = arith.mulf %123, %127 : vector<1x7xf32>
    %c0_32 = arith.constant 0 : index
    %c1 = arith.constant 1 : index
    %c0_33 = arith.constant 0 : index
    %129 = vector.load %arg8[%c0_32, %c1, %c0_33] : memref<1x8x7xf32, #tpu.memory_space<vmem>>, vector<1x1x7xf32>
    %130 = vector.shape_cast %129 : vector<1x1x7xf32> to vector<1x7xf32>
    %131 = vector.shape_cast %128 : vector<1x7xf32> to vector<1x1x7xf32>
    tpu.vector_store %arg8[%c0_32, %c1, %c0_33], %131 {strides = array<i32>} : memref<1x8x7xf32, #tpu.memory_space<vmem>>, vector<1x1x7xf32>,
    %132 = vector.extract_strided_slice %10 {offsets = [0, 2, 0], sizes = [1, 1, 28], strides = [1, 1, 1]} : vector<1x8x28xf32> to vector<1x1x28xf32>
    %133 = vector.shape_cast %132 : vector<1x1x28xf32> to vector<1x28xf32>
    %cst_34 = arith.constant dense<0.000000e+00> : vector<1x28xf32>
    %134 = tpu.matmul %100, %2, %cst_34 {dimension_numbers = #tpu.dot_dimension_numbers<[1], [0], [0], [1], [0, 0, 1, 1], [], []>} : vector<1x7xf32>, vector<7x28xf32>, vector<1x28xf32> -> vector<1x28xf32>
    %135 = arith.addf %133, %134 : vector<1x28xf32>
    %136 = vector.extract_strided_slice %135 {offsets = [0, 0], sizes = [1, 7], strides = [1, 1]} : vector<1x28xf32> to vector<1x7xf32>
    %137 = arith.negf %136 : vector<1x7xf32>
    %138 = math.exp %137 : vector<1x7xf32>
    %cst_35 = arith.constant 1.000000e+00 : f32
    %139 = vector.broadcast %cst_35 : f32 to vector<1x7xf32>
    %140 = arith.addf %139, %138 : vector<1x7xf32>
    %141 = arith.divf %139, %140 : vector<1x7xf32>
    %142 = vector.extract_strided_slice %135 {offsets = [0, 7], sizes = [1, 7], strides = [1, 1]} : vector<1x28xf32> to vector<1x7xf32>
    %143 = arith.negf %142 : vector<1x7xf32>
    %144 = math.exp %143 : vector<1x7xf32>
    %cst_36 = arith.constant 1.000000e+00 : f32
    %145 = vector.broadcast %cst_36 : f32 to vector<1x7xf32>
    %146 = arith.addf %145, %144 : vector<1x7xf32>
    %147 = arith.divf %145, %146 : vector<1x7xf32>
    %148 = vector.extract_strided_slice %135 {offsets = [0, 14], sizes = [1, 7], strides = [1, 1]} : vector<1x28xf32> to vector<1x7xf32>
    %149 = math.tanh %148 : vector<1x7xf32>
    %150 = vector.extract_strided_slice %135 {offsets = [0, 21], sizes = [1, 7], strides = [1, 1]} : vector<1x28xf32> to vector<1x7xf32>
    %151 = arith.negf %150 : vector<1x7xf32>
    %152 = math.exp %151 : vector<1x7xf32>
    %cst_37 = arith.constant 1.000000e+00 : f32
    %153 = vector.broadcast %cst_37 : f32 to vector<1x7xf32>
    %154 = arith.addf %153, %152 : vector<1x7xf32>
    %155 = arith.divf %153, %154 : vector<1x7xf32>
    %156 = arith.mulf %147, %98 : vector<1x7xf32>
    %157 = arith.mulf %141, %149 : vector<1x7xf32>
    %158 = arith.addf %156, %157 : vector<1x7xf32>
    %159 = math.tanh %158 : vector<1x7xf32>
    %160 = arith.mulf %155, %159 : vector<1x7xf32>
    %161 = tpu.concatenate %160, %128 in 1 : vector<1x7xf32>, vector<1x7xf32> -> vector<1x14xf32>
    %cst_38 = arith.constant dense<0.000000e+00> : vector<1x28xf32>
    %162 = tpu.matmul %161, %3, %cst_38 {dimension_numbers = #tpu.dot_dimension_numbers<[1], [0], [0], [1], [0, 0, 1, 1], [], []>} : vector<1x14xf32>, vector<14x28xf32>, vector<1x28xf32> -> vector<1x28xf32>
    %163 = arith.addf %162, %5 : vector<1x28xf32>
    %164 = vector.extract_strided_slice %163 {offsets = [0, 0], sizes = [1, 7], strides = [1, 1]} : vector<1x28xf32> to vector<1x7xf32>
    %165 = arith.negf %164 : vector<1x7xf32>
    %166 = math.exp %165 : vector<1x7xf32>
    %cst_39 = arith.constant 1.000000e+00 : f32
    %167 = vector.broadcast %cst_39 : f32 to vector<1x7xf32>
    %168 = arith.addf %167, %166 : vector<1x7xf32>
    %169 = arith.divf %167, %168 : vector<1x7xf32>
    %170 = vector.extract_strided_slice %163 {offsets = [0, 7], sizes = [1, 7], strides = [1, 1]} : vector<1x28xf32> to vector<1x7xf32>
    %171 = arith.negf %170 : vector<1x7xf32>
    %172 = math.exp %171 : vector<1x7xf32>
    %cst_40 = arith.constant 1.000000e+00 : f32
    %173 = vector.broadcast %cst_40 : f32 to vector<1x7xf32>
    %174 = arith.addf %173, %172 : vector<1x7xf32>
    %175 = arith.divf %173, %174 : vector<1x7xf32>
    %176 = vector.extract_strided_slice %163 {offsets = [0, 14], sizes = [1, 7], strides = [1, 1]} : vector<1x28xf32> to vector<1x7xf32>
    %177 = math.tanh %176 : vector<1x7xf32>
    %178 = vector.extract_strided_slice %163 {offsets = [0, 21], sizes = [1, 7], strides = [1, 1]} : vector<1x28xf32> to vector<1x7xf32>
    %179 = arith.negf %178 : vector<1x7xf32>
    %180 = math.exp %179 : vector<1x7xf32>
    %cst_41 = arith.constant 1.000000e+00 : f32
    %181 = vector.broadcast %cst_41 : f32 to vector<1x7xf32>
    %182 = arith.addf %181, %180 : vector<1x7xf32>
    %183 = arith.divf %181, %182 : vector<1x7xf32>
    %184 = arith.mulf %175, %126 : vector<1x7xf32>
    %185 = arith.mulf %169, %177 : vector<1x7xf32>
    %186 = arith.addf %184, %185 : vector<1x7xf32>
    %187 = math.tanh %186 : vector<1x7xf32>
    %188 = arith.mulf %183, %187 : vector<1x7xf32>
    %c0_42 = arith.constant 0 : index
    %c2 = arith.constant 2 : index
    %c0_43 = arith.constant 0 : index
    %189 = vector.load %arg8[%c0_42, %c2, %c0_43] : memref<1x8x7xf32, #tpu.memory_space<vmem>>, vector<1x1x7xf32>
    %190 = vector.shape_cast %189 : vector<1x1x7xf32> to vector<1x7xf32>
    %191 = vector.shape_cast %188 : vector<1x7xf32> to vector<1x1x7xf32>
    tpu.vector_store %arg8[%c0_42, %c2, %c0_43], %191 {strides = array<i32>} : memref<1x8x7xf32, #tpu.memory_space<vmem>>, vector<1x1x7xf32>,
    %192 = vector.extract_strided_slice %10 {offsets = [0, 3, 0], sizes = [1, 1, 28], strides = [1, 1, 1]} : vector<1x8x28xf32> to vector<1x1x28xf32>
    %193 = vector.shape_cast %192 : vector<1x1x28xf32> to vector<1x28xf32>
    %cst_44 = arith.constant dense<0.000000e+00> : vector<1x28xf32>
    %194 = tpu.matmul %160, %2, %cst_44 {dimension_numbers = #tpu.dot_dimension_numbers<[1], [0], [0], [1], [0, 0, 1, 1], [], []>} : vector<1x7xf32>, vector<7x28xf32>, vector<1x28xf32> -> vector<1x28xf32>
    %195 = arith.addf %193, %194 : vector<1x28xf32>
    %196 = vector.extract_strided_slice %195 {offsets = [0, 0], sizes = [1, 7], strides = [1, 1]} : vector<1x28xf32> to vector<1x7xf32>
    %197 = arith.negf %196 : vector<1x7xf32>
    %198 = math.exp %197 : vector<1x7xf32>
    %cst_45 = arith.constant 1.000000e+00 : f32
    %199 = vector.broadcast %cst_45 : f32 to vector<1x7xf32>
    %200 = arith.addf %199, %198 : vector<1x7xf32>
    %201 = arith.divf %199, %200 : vector<1x7xf32>
    %202 = vector.extract_strided_slice %195 {offsets = [0, 7], sizes = [1, 7], strides = [1, 1]} : vector<1x28xf32> to vector<1x7xf32>
    %203 = arith.negf %202 : vector<1x7xf32>
    %204 = math.exp %203 : vector<1x7xf32>
    %cst_46 = arith.constant 1.000000e+00 : f32
    %205 = vector.broadcast %cst_46 : f32 to vector<1x7xf32>
    %206 = arith.addf %205, %204 : vector<1x7xf32>
    %207 = arith.divf %205, %206 : vector<1x7xf32>
    %208 = vector.extract_strided_slice %195 {offsets = [0, 14], sizes = [1, 7], strides = [1, 1]} : vector<1x28xf32> to vector<1x7xf32>
    %209 = math.tanh %208 : vector<1x7xf32>
    %210 = vector.extract_strided_slice %195 {offsets = [0, 21], sizes = [1, 7], strides = [1, 1]} : vector<1x28xf32> to vector<1x7xf32>
    %211 = arith.negf %210 : vector<1x7xf32>
    %212 = math.exp %211 : vector<1x7xf32>
    %cst_47 = arith.constant 1.000000e+00 : f32
    %213 = vector.broadcast %cst_47 : f32 to vector<1x7xf32>
    %214 = arith.addf %213, %212 : vector<1x7xf32>
    %215 = arith.divf %213, %214 : vector<1x7xf32>
    %216 = arith.mulf %207, %158 : vector<1x7xf32>
    %217 = arith.mulf %201, %209 : vector<1x7xf32>
    %218 = arith.addf %216, %217 : vector<1x7xf32>
    %219 = math.tanh %218 : vector<1x7xf32>
    %220 = arith.mulf %215, %219 : vector<1x7xf32>
    %221 = tpu.concatenate %220, %188 in 1 : vector<1x7xf32>, vector<1x7xf32> -> vector<1x14xf32>
    %cst_48 = arith.constant dense<0.000000e+00> : vector<1x28xf32>
    %222 = tpu.matmul %221, %3, %cst_48 {dimension_numbers = #tpu.dot_dimension_numbers<[1], [0], [0], [1], [0, 0, 1, 1], [], []>} : vector<1x14xf32>, vector<14x28xf32>, vector<1x28xf32> -> vector<1x28xf32>
    %223 = arith.addf %222, %5 : vector<1x28xf32>
    %224 = vector.extract_strided_slice %223 {offsets = [0, 0], sizes = [1, 7], strides = [1, 1]} : vector<1x28xf32> to vector<1x7xf32>
    %225 = arith.negf %224 : vector<1x7xf32>
    %226 = math.exp %225 : vector<1x7xf32>
    %cst_49 = arith.constant 1.000000e+00 : f32
    %227 = vector.broadcast %cst_49 : f32 to vector<1x7xf32>
    %228 = arith.addf %227, %226 : vector<1x7xf32>
    %229 = arith.divf %227, %228 : vector<1x7xf32>
    %230 = vector.extract_strided_slice %223 {offsets = [0, 7], sizes = [1, 7], strides = [1, 1]} : vector<1x28xf32> to vector<1x7xf32>
    %231 = arith.negf %230 : vector<1x7xf32>
    %232 = math.exp %231 : vector<1x7xf32>
    %cst_50 = arith.constant 1.000000e+00 : f32
    %233 = vector.broadcast %cst_50 : f32 to vector<1x7xf32>
    %234 = arith.addf %233, %232 : vector<1x7xf32>
    %235 = arith.divf %233, %234 : vector<1x7xf32>
    %236 = vector.extract_strided_slice %223 {offsets = [0, 14], sizes = [1, 7], strides = [1, 1]} : vector<1x28xf32> to vector<1x7xf32>
    %237 = math.tanh %236 : vector<1x7xf32>
    %238 = vector.extract_strided_slice %223 {offsets = [0, 21], sizes = [1, 7], strides = [1, 1]} : vector<1x28xf32> to vector<1x7xf32>
    %239 = arith.negf %238 : vector<1x7xf32>
    %240 = math.exp %239 : vector<1x7xf32>
    %cst_51 = arith.constant 1.000000e+00 : f32
    %241 = vector.broadcast %cst_51 : f32 to vector<1x7xf32>
    %242 = arith.addf %241, %240 : vector<1x7xf32>
    %243 = arith.divf %241, %242 : vector<1x7xf32>
    %244 = arith.mulf %235, %186 : vector<1x7xf32>
    %245 = arith.mulf %229, %237 : vector<1x7xf32>
    %246 = arith.addf %244, %245 : vector<1x7xf32>
    %247 = math.tanh %246 : vector<1x7xf32>
    %248 = arith.mulf %243, %247 : vector<1x7xf32>
    %c0_52 = arith.constant 0 : index
    %c3 = arith.constant 3 : index
    %c0_53 = arith.constant 0 : index
    %249 = vector.load %arg8[%c0_52, %c3, %c0_53] : memref<1x8x7xf32, #tpu.memory_space<vmem>>, vector<1x1x7xf32>
    %250 = vector.shape_cast %249 : vector<1x1x7xf32> to vector<1x7xf32>
    %251 = vector.shape_cast %248 : vector<1x7xf32> to vector<1x1x7xf32>
    tpu.vector_store %arg8[%c0_52, %c3, %c0_53], %251 {strides = array<i32>} : memref<1x8x7xf32, #tpu.memory_space<vmem>>, vector<1x1x7xf32>,
    %252 = vector.extract_strided_slice %10 {offsets = [0, 4, 0], sizes = [1, 1, 28], strides = [1, 1, 1]} : vector<1x8x28xf32> to vector<1x1x28xf32>
    %253 = vector.shape_cast %252 : vector<1x1x28xf32> to vector<1x28xf32>
    %cst_54 = arith.constant dense<0.000000e+00> : vector<1x28xf32>
    %254 = tpu.matmul %220, %2, %cst_54 {dimension_numbers = #tpu.dot_dimension_numbers<[1], [0], [0], [1], [0, 0, 1, 1], [], []>} : vector<1x7xf32>, vector<7x28xf32>, vector<1x28xf32> -> vector<1x28xf32>
    %255 = arith.addf %253, %254 : vector<1x28xf32>
    %256 = vector.extract_strided_slice %255 {offsets = [0, 0], sizes = [1, 7], strides = [1, 1]} : vector<1x28xf32> to vector<1x7xf32>
    %257 = arith.negf %256 : vector<1x7xf32>
    %258 = math.exp %257 : vector<1x7xf32>
    %cst_55 = arith.constant 1.000000e+00 : f32
    %259 = vector.broadcast %cst_55 : f32 to vector<1x7xf32>
    %260 = arith.addf %259, %258 : vector<1x7xf32>
    %261 = arith.divf %259, %260 : vector<1x7xf32>
    %262 = vector.extract_strided_slice %255 {offsets = [0, 7], sizes = [1, 7], strides = [1, 1]} : vector<1x28xf32> to vector<1x7xf32>
    %263 = arith.negf %262 : vector<1x7xf32>
    %264 = math.exp %263 : vector<1x7xf32>
    %cst_56 = arith.constant 1.000000e+00 : f32
    %265 = vector.broadcast %cst_56 : f32 to vector<1x7xf32>
    %266 = arith.addf %265, %264 : vector<1x7xf32>
    %267 = arith.divf %265, %266 : vector<1x7xf32>
    %268 = vector.extract_strided_slice %255 {offsets = [0, 14], sizes = [1, 7], strides = [1, 1]} : vector<1x28xf32> to vector<1x7xf32>
    %269 = math.tanh %268 : vector<1x7xf32>
    %270 = vector.extract_strided_slice %255 {offsets = [0, 21], sizes = [1, 7], strides = [1, 1]} : vector<1x28xf32> to vector<1x7xf32>
    %271 = arith.negf %270 : vector<1x7xf32>
    %272 = math.exp %271 : vector<1x7xf32>
    %cst_57 = arith.constant 1.000000e+00 : f32
    %273 = vector.broadcast %cst_57 : f32 to vector<1x7xf32>
    %274 = arith.addf %273, %272 : vector<1x7xf32>
    %275 = arith.divf %273, %274 : vector<1x7xf32>
    %276 = arith.mulf %267, %218 : vector<1x7xf32>
    %277 = arith.mulf %261, %269 : vector<1x7xf32>
    %278 = arith.addf %276, %277 : vector<1x7xf32>
    %279 = math.tanh %278 : vector<1x7xf32>
    %280 = arith.mulf %275, %279 : vector<1x7xf32>
    %281 = tpu.concatenate %280, %248 in 1 : vector<1x7xf32>, vector<1x7xf32> -> vector<1x14xf32>
    %cst_58 = arith.constant dense<0.000000e+00> : vector<1x28xf32>
    %282 = tpu.matmul %281, %3, %cst_58 {dimension_numbers = #tpu.dot_dimension_numbers<[1], [0], [0], [1], [0, 0, 1, 1], [], []>} : vector<1x14xf32>, vector<14x28xf32>, vector<1x28xf32> -> vector<1x28xf32>
    %283 = arith.addf %282, %5 : vector<1x28xf32>
    %284 = vector.extract_strided_slice %283 {offsets = [0, 0], sizes = [1, 7], strides = [1, 1]} : vector<1x28xf32> to vector<1x7xf32>
    %285 = arith.negf %284 : vector<1x7xf32>
    %286 = math.exp %285 : vector<1x7xf32>
    %cst_59 = arith.constant 1.000000e+00 : f32
    %287 = vector.broadcast %cst_59 : f32 to vector<1x7xf32>
    %288 = arith.addf %287, %286 : vector<1x7xf32>
    %289 = arith.divf %287, %288 : vector<1x7xf32>
    %290 = vector.extract_strided_slice %283 {offsets = [0, 7], sizes = [1, 7], strides = [1, 1]} : vector<1x28xf32> to vector<1x7xf32>
    %291 = arith.negf %290 : vector<1x7xf32>
    %292 = math.exp %291 : vector<1x7xf32>
    %cst_60 = arith.constant 1.000000e+00 : f32
    %293 = vector.broadcast %cst_60 : f32 to vector<1x7xf32>
    %294 = arith.addf %293, %292 : vector<1x7xf32>
    %295 = arith.divf %293, %294 : vector<1x7xf32>
    %296 = vector.extract_strided_slice %283 {offsets = [0, 14], sizes = [1, 7], strides = [1, 1]} : vector<1x28xf32> to vector<1x7xf32>
    %297 = math.tanh %296 : vector<1x7xf32>
    %298 = vector.extract_strided_slice %283 {offsets = [0, 21], sizes = [1, 7], strides = [1, 1]} : vector<1x28xf32> to vector<1x7xf32>
    %299 = arith.negf %298 : vector<1x7xf32>
    %300 = math.exp %299 : vector<1x7xf32>
    %cst_61 = arith.constant 1.000000e+00 : f32
    %301 = vector.broadcast %cst_61 : f32 to vector<1x7xf32>
    %302 = arith.addf %301, %300 : vector<1x7xf32>
    %303 = arith.divf %301, %302 : vector<1x7xf32>
    %304 = arith.mulf %295, %246 : vector<1x7xf32>
    %305 = arith.mulf %289, %297 : vector<1x7xf32>
    %306 = arith.addf %304, %305 : vector<1x7xf32>
    %307 = math.tanh %306 : vector<1x7xf32>
    %308 = arith.mulf %303, %307 : vector<1x7xf32>
    %c0_62 = arith.constant 0 : index
    %c4 = arith.constant 4 : index
    %c0_63 = arith.constant 0 : index
    %309 = vector.load %arg8[%c0_62, %c4, %c0_63] : memref<1x8x7xf32, #tpu.memory_space<vmem>>, vector<1x1x7xf32>
    %310 = vector.shape_cast %309 : vector<1x1x7xf32> to vector<1x7xf32>
    %311 = vector.shape_cast %308 : vector<1x7xf32> to vector<1x1x7xf32>
    tpu.vector_store %arg8[%c0_62, %c4, %c0_63], %311 {strides = array<i32>} : memref<1x8x7xf32, #tpu.memory_space<vmem>>, vector<1x1x7xf32>,
    %312 = vector.extract_strided_slice %10 {offsets = [0, 5, 0], sizes = [1, 1, 28], strides = [1, 1, 1]} : vector<1x8x28xf32> to vector<1x1x28xf32>
    %313 = vector.shape_cast %312 : vector<1x1x28xf32> to vector<1x28xf32>
    %cst_64 = arith.constant dense<0.000000e+00> : vector<1x28xf32>
    %314 = tpu.matmul %280, %2, %cst_64 {dimension_numbers = #tpu.dot_dimension_numbers<[1], [0], [0], [1], [0, 0, 1, 1], [], []>} : vector<1x7xf32>, vector<7x28xf32>, vector<1x28xf32> -> vector<1x28xf32>
    %315 = arith.addf %313, %314 : vector<1x28xf32>
    %316 = vector.extract_strided_slice %315 {offsets = [0, 0], sizes = [1, 7], strides = [1, 1]} : vector<1x28xf32> to vector<1x7xf32>
    %317 = arith.negf %316 : vector<1x7xf32>
    %318 = math.exp %317 : vector<1x7xf32>
    %cst_65 = arith.constant 1.000000e+00 : f32
    %319 = vector.broadcast %cst_65 : f32 to vector<1x7xf32>
    %320 = arith.addf %319, %318 : vector<1x7xf32>
    %321 = arith.divf %319, %320 : vector<1x7xf32>
    %322 = vector.extract_strided_slice %315 {offsets = [0, 7], sizes = [1, 7], strides = [1, 1]} : vector<1x28xf32> to vector<1x7xf32>
    %323 = arith.negf %322 : vector<1x7xf32>
    %324 = math.exp %323 : vector<1x7xf32>
    %cst_66 = arith.constant 1.000000e+00 : f32
    %325 = vector.broadcast %cst_66 : f32 to vector<1x7xf32>
    %326 = arith.addf %325, %324 : vector<1x7xf32>
    %327 = arith.divf %325, %326 : vector<1x7xf32>
    %328 = vector.extract_strided_slice %315 {offsets = [0, 14], sizes = [1, 7], strides = [1, 1]} : vector<1x28xf32> to vector<1x7xf32>
    %329 = math.tanh %328 : vector<1x7xf32>
    %330 = vector.extract_strided_slice %315 {offsets = [0, 21], sizes = [1, 7], strides = [1, 1]} : vector<1x28xf32> to vector<1x7xf32>
    %331 = arith.negf %330 : vector<1x7xf32>
    %332 = math.exp %331 : vector<1x7xf32>
    %cst_67 = arith.constant 1.000000e+00 : f32
    %333 = vector.broadcast %cst_67 : f32 to vector<1x7xf32>
    %334 = arith.addf %333, %332 : vector<1x7xf32>
    %335 = arith.divf %333, %334 : vector<1x7xf32>
    %336 = arith.mulf %327, %278 : vector<1x7xf32>
    %337 = arith.mulf %321, %329 : vector<1x7xf32>
    %338 = arith.addf %336, %337 : vector<1x7xf32>
    %339 = math.tanh %338 : vector<1x7xf32>
    %340 = arith.mulf %335, %339 : vector<1x7xf32>
    %341 = tpu.concatenate %340, %308 in 1 : vector<1x7xf32>, vector<1x7xf32> -> vector<1x14xf32>
    %cst_68 = arith.constant dense<0.000000e+00> : vector<1x28xf32>
    %342 = tpu.matmul %341, %3, %cst_68 {dimension_numbers = #tpu.dot_dimension_numbers<[1], [0], [0], [1], [0, 0, 1, 1], [], []>} : vector<1x14xf32>, vector<14x28xf32>, vector<1x28xf32> -> vector<1x28xf32>
    %343 = arith.addf %342, %5 : vector<1x28xf32>
    %344 = vector.extract_strided_slice %343 {offsets = [0, 0], sizes = [1, 7], strides = [1, 1]} : vector<1x28xf32> to vector<1x7xf32>
    %345 = arith.negf %344 : vector<1x7xf32>
    %346 = math.exp %345 : vector<1x7xf32>
    %cst_69 = arith.constant 1.000000e+00 : f32
    %347 = vector.broadcast %cst_69 : f32 to vector<1x7xf32>
    %348 = arith.addf %347, %346 : vector<1x7xf32>
    %349 = arith.divf %347, %348 : vector<1x7xf32>
    %350 = vector.extract_strided_slice %343 {offsets = [0, 7], sizes = [1, 7], strides = [1, 1]} : vector<1x28xf32> to vector<1x7xf32>
    %351 = arith.negf %350 : vector<1x7xf32>
    %352 = math.exp %351 : vector<1x7xf32>
    %cst_70 = arith.constant 1.000000e+00 : f32
    %353 = vector.broadcast %cst_70 : f32 to vector<1x7xf32>
    %354 = arith.addf %353, %352 : vector<1x7xf32>
    %355 = arith.divf %353, %354 : vector<1x7xf32>
    %356 = vector.extract_strided_slice %343 {offsets = [0, 14], sizes = [1, 7], strides = [1, 1]} : vector<1x28xf32> to vector<1x7xf32>
    %357 = math.tanh %356 : vector<1x7xf32>
    %358 = vector.extract_strided_slice %343 {offsets = [0, 21], sizes = [1, 7], strides = [1, 1]} : vector<1x28xf32> to vector<1x7xf32>
    %359 = arith.negf %358 : vector<1x7xf32>
    %360 = math.exp %359 : vector<1x7xf32>
    %cst_71 = arith.constant 1.000000e+00 : f32
    %361 = vector.broadcast %cst_71 : f32 to vector<1x7xf32>
    %362 = arith.addf %361, %360 : vector<1x7xf32>
    %363 = arith.divf %361, %362 : vector<1x7xf32>
    %364 = arith.mulf %355, %306 : vector<1x7xf32>
    %365 = arith.mulf %349, %357 : vector<1x7xf32>
    %366 = arith.addf %364, %365 : vector<1x7xf32>
    %367 = math.tanh %366 : vector<1x7xf32>
    %368 = arith.mulf %363, %367 : vector<1x7xf32>
    %c0_72 = arith.constant 0 : index
    %c5 = arith.constant 5 : index
    %c0_73 = arith.constant 0 : index
    %369 = vector.load %arg8[%c0_72, %c5, %c0_73] : memref<1x8x7xf32, #tpu.memory_space<vmem>>, vector<1x1x7xf32>
    %370 = vector.shape_cast %369 : vector<1x1x7xf32> to vector<1x7xf32>
    %371 = vector.shape_cast %368 : vector<1x7xf32> to vector<1x1x7xf32>
    tpu.vector_store %arg8[%c0_72, %c5, %c0_73], %371 {strides = array<i32>} : memref<1x8x7xf32, #tpu.memory_space<vmem>>, vector<1x1x7xf32>,
    %372 = vector.extract_strided_slice %10 {offsets = [0, 6, 0], sizes = [1, 1, 28], strides = [1, 1, 1]} : vector<1x8x28xf32> to vector<1x1x28xf32>
    %373 = vector.shape_cast %372 : vector<1x1x28xf32> to vector<1x28xf32>
    %cst_74 = arith.constant dense<0.000000e+00> : vector<1x28xf32>
    %374 = tpu.matmul %340, %2, %cst_74 {dimension_numbers = #tpu.dot_dimension_numbers<[1], [0], [0], [1], [0, 0, 1, 1], [], []>} : vector<1x7xf32>, vector<7x28xf32>, vector<1x28xf32> -> vector<1x28xf32>
    %375 = arith.addf %373, %374 : vector<1x28xf32>
    %376 = vector.extract_strided_slice %375 {offsets = [0, 0], sizes = [1, 7], strides = [1, 1]} : vector<1x28xf32> to vector<1x7xf32>
    %377 = arith.negf %376 : vector<1x7xf32>
    %378 = math.exp %377 : vector<1x7xf32>
    %cst_75 = arith.constant 1.000000e+00 : f32
    %379 = vector.broadcast %cst_75 : f32 to vector<1x7xf32>
    %380 = arith.addf %379, %378 : vector<1x7xf32>
    %381 = arith.divf %379, %380 : vector<1x7xf32>
    %382 = vector.extract_strided_slice %375 {offsets = [0, 7], sizes = [1, 7], strides = [1, 1]} : vector<1x28xf32> to vector<1x7xf32>
    %383 = arith.negf %382 : vector<1x7xf32>
    %384 = math.exp %383 : vector<1x7xf32>
    %cst_76 = arith.constant 1.000000e+00 : f32
    %385 = vector.broadcast %cst_76 : f32 to vector<1x7xf32>
    %386 = arith.addf %385, %384 : vector<1x7xf32>
    %387 = arith.divf %385, %386 : vector<1x7xf32>
    %388 = vector.extract_strided_slice %375 {offsets = [0, 14], sizes = [1, 7], strides = [1, 1]} : vector<1x28xf32> to vector<1x7xf32>
    %389 = math.tanh %388 : vector<1x7xf32>
    %390 = vector.extract_strided_slice %375 {offsets = [0, 21], sizes = [1, 7], strides = [1, 1]} : vector<1x28xf32> to vector<1x7xf32>
    %391 = arith.negf %390 : vector<1x7xf32>
    %392 = math.exp %391 : vector<1x7xf32>
    %cst_77 = arith.constant 1.000000e+00 : f32
    %393 = vector.broadcast %cst_77 : f32 to vector<1x7xf32>
    %394 = arith.addf %393, %392 : vector<1x7xf32>
    %395 = arith.divf %393, %394 : vector<1x7xf32>
    %396 = arith.mulf %387, %338 : vector<1x7xf32>
    %397 = arith.mulf %381, %389 : vector<1x7xf32>
    %398 = arith.addf %396, %397 : vector<1x7xf32>
    %399 = math.tanh %398 : vector<1x7xf32>
    %400 = arith.mulf %395, %399 : vector<1x7xf32>
    %401 = tpu.concatenate %400, %368 in 1 : vector<1x7xf32>, vector<1x7xf32> -> vector<1x14xf32>
    %cst_78 = arith.constant dense<0.000000e+00> : vector<1x28xf32>
    %402 = tpu.matmul %401, %3, %cst_78 {dimension_numbers = #tpu.dot_dimension_numbers<[1], [0], [0], [1], [0, 0, 1, 1], [], []>} : vector<1x14xf32>, vector<14x28xf32>, vector<1x28xf32> -> vector<1x28xf32>
    %403 = arith.addf %402, %5 : vector<1x28xf32>
    %404 = vector.extract_strided_slice %403 {offsets = [0, 0], sizes = [1, 7], strides = [1, 1]} : vector<1x28xf32> to vector<1x7xf32>
    %405 = arith.negf %404 : vector<1x7xf32>
    %406 = math.exp %405 : vector<1x7xf32>
    %cst_79 = arith.constant 1.000000e+00 : f32
    %407 = vector.broadcast %cst_79 : f32 to vector<1x7xf32>
    %408 = arith.addf %407, %406 : vector<1x7xf32>
    %409 = arith.divf %407, %408 : vector<1x7xf32>
    %410 = vector.extract_strided_slice %403 {offsets = [0, 7], sizes = [1, 7], strides = [1, 1]} : vector<1x28xf32> to vector<1x7xf32>
    %411 = arith.negf %410 : vector<1x7xf32>
    %412 = math.exp %411 : vector<1x7xf32>
    %cst_80 = arith.constant 1.000000e+00 : f32
    %413 = vector.broadcast %cst_80 : f32 to vector<1x7xf32>
    %414 = arith.addf %413, %412 : vector<1x7xf32>
    %415 = arith.divf %413, %414 : vector<1x7xf32>
    %416 = vector.extract_strided_slice %403 {offsets = [0, 14], sizes = [1, 7], strides = [1, 1]} : vector<1x28xf32> to vector<1x7xf32>
    %417 = math.tanh %416 : vector<1x7xf32>
    %418 = vector.extract_strided_slice %403 {offsets = [0, 21], sizes = [1, 7], strides = [1, 1]} : vector<1x28xf32> to vector<1x7xf32>
    %419 = arith.negf %418 : vector<1x7xf32>
    %420 = math.exp %419 : vector<1x7xf32>
    %cst_81 = arith.constant 1.000000e+00 : f32
    %421 = vector.broadcast %cst_81 : f32 to vector<1x7xf32>
    %422 = arith.addf %421, %420 : vector<1x7xf32>
    %423 = arith.divf %421, %422 : vector<1x7xf32>
    %424 = arith.mulf %415, %366 : vector<1x7xf32>
    %425 = arith.mulf %409, %417 : vector<1x7xf32>
    %426 = arith.addf %424, %425 : vector<1x7xf32>
    %427 = math.tanh %426 : vector<1x7xf32>
    %428 = arith.mulf %423, %427 : vector<1x7xf32>
    %c0_82 = arith.constant 0 : index
    %c6 = arith.constant 6 : index
    %c0_83 = arith.constant 0 : index
    %429 = vector.load %arg8[%c0_82, %c6, %c0_83] : memref<1x8x7xf32, #tpu.memory_space<vmem>>, vector<1x1x7xf32>
    %430 = vector.shape_cast %429 : vector<1x1x7xf32> to vector<1x7xf32>
    %431 = vector.shape_cast %428 : vector<1x7xf32> to vector<1x1x7xf32>
    tpu.vector_store %arg8[%c0_82, %c6, %c0_83], %431 {strides = array<i32>} : memref<1x8x7xf32, #tpu.memory_space<vmem>>, vector<1x1x7xf32>,
    %432 = vector.extract_strided_slice %10 {offsets = [0, 7, 0], sizes = [1, 1, 28], strides = [1, 1, 1]} : vector<1x8x28xf32> to vector<1x1x28xf32>
    %433 = vector.shape_cast %432 : vector<1x1x28xf32> to vector<1x28xf32>
    %cst_84 = arith.constant dense<0.000000e+00> : vector<1x28xf32>
    %434 = tpu.matmul %400, %2, %cst_84 {dimension_numbers = #tpu.dot_dimension_numbers<[1], [0], [0], [1], [0, 0, 1, 1], [], []>} : vector<1x7xf32>, vector<7x28xf32>, vector<1x28xf32> -> vector<1x28xf32>
    %435 = arith.addf %433, %434 : vector<1x28xf32>
    %436 = vector.extract_strided_slice %435 {offsets = [0, 0], sizes = [1, 7], strides = [1, 1]} : vector<1x28xf32> to vector<1x7xf32>
    %437 = arith.negf %436 : vector<1x7xf32>
    %438 = math.exp %437 : vector<1x7xf32>
    %cst_85 = arith.constant 1.000000e+00 : f32
    %439 = vector.broadcast %cst_85 : f32 to vector<1x7xf32>
    %440 = arith.addf %439, %438 : vector<1x7xf32>
    %441 = arith.divf %439, %440 : vector<1x7xf32>
    %442 = vector.extract_strided_slice %435 {offsets = [0, 7], sizes = [1, 7], strides = [1, 1]} : vector<1x28xf32> to vector<1x7xf32>
    %443 = arith.negf %442 : vector<1x7xf32>
    %444 = math.exp %443 : vector<1x7xf32>
    %cst_86 = arith.constant 1.000000e+00 : f32
    %445 = vector.broadcast %cst_86 : f32 to vector<1x7xf32>
    %446 = arith.addf %445, %444 : vector<1x7xf32>
    %447 = arith.divf %445, %446 : vector<1x7xf32>
    %448 = vector.extract_strided_slice %435 {offsets = [0, 14], sizes = [1, 7], strides = [1, 1]} : vector<1x28xf32> to vector<1x7xf32>
    %449 = math.tanh %448 : vector<1x7xf32>
    %450 = vector.extract_strided_slice %435 {offsets = [0, 21], sizes = [1, 7], strides = [1, 1]} : vector<1x28xf32> to vector<1x7xf32>
    %451 = arith.negf %450 : vector<1x7xf32>
    %452 = math.exp %451 : vector<1x7xf32>
    %cst_87 = arith.constant 1.000000e+00 : f32
    %453 = vector.broadcast %cst_87 : f32 to vector<1x7xf32>
    %454 = arith.addf %453, %452 : vector<1x7xf32>
    %455 = arith.divf %453, %454 : vector<1x7xf32>
    %456 = arith.mulf %447, %398 : vector<1x7xf32>
    %457 = arith.mulf %441, %449 : vector<1x7xf32>
    %458 = arith.addf %456, %457 : vector<1x7xf32>
    %459 = math.tanh %458 : vector<1x7xf32>
    %460 = arith.mulf %455, %459 : vector<1x7xf32>
    %461 = tpu.concatenate %460, %428 in 1 : vector<1x7xf32>, vector<1x7xf32> -> vector<1x14xf32>
    %cst_88 = arith.constant dense<0.000000e+00> : vector<1x28xf32>
    %462 = tpu.matmul %461, %3, %cst_88 {dimension_numbers = #tpu.dot_dimension_numbers<[1], [0], [0], [1], [0, 0, 1, 1], [], []>} : vector<1x14xf32>, vector<14x28xf32>, vector<1x28xf32> -> vector<1x28xf32>
    %463 = arith.addf %462, %5 : vector<1x28xf32>
    %464 = vector.extract_strided_slice %463 {offsets = [0, 0], sizes = [1, 7], strides = [1, 1]} : vector<1x28xf32> to vector<1x7xf32>
    %465 = arith.negf %464 : vector<1x7xf32>
    %466 = math.exp %465 : vector<1x7xf32>
    %cst_89 = arith.constant 1.000000e+00 : f32
    %467 = vector.broadcast %cst_89 : f32 to vector<1x7xf32>
    %468 = arith.addf %467, %466 : vector<1x7xf32>
    %469 = arith.divf %467, %468 : vector<1x7xf32>
    %470 = vector.extract_strided_slice %463 {offsets = [0, 7], sizes = [1, 7], strides = [1, 1]} : vector<1x28xf32> to vector<1x7xf32>
    %471 = arith.negf %470 : vector<1x7xf32>
    %472 = math.exp %471 : vector<1x7xf32>
    %cst_90 = arith.constant 1.000000e+00 : f32
    %473 = vector.broadcast %cst_90 : f32 to vector<1x7xf32>
    %474 = arith.addf %473, %472 : vector<1x7xf32>
    %475 = arith.divf %473, %474 : vector<1x7xf32>
    %476 = vector.extract_strided_slice %463 {offsets = [0, 14], sizes = [1, 7], strides = [1, 1]} : vector<1x28xf32> to vector<1x7xf32>
    %477 = math.tanh %476 : vector<1x7xf32>
    %478 = vector.extract_strided_slice %463 {offsets = [0, 21], sizes = [1, 7], strides = [1, 1]} : vector<1x28xf32> to vector<1x7xf32>
    %479 = arith.negf %478 : vector<1x7xf32>
    %480 = math.exp %479 : vector<1x7xf32>
    %cst_91 = arith.constant 1.000000e+00 : f32
    %481 = vector.broadcast %cst_91 : f32 to vector<1x7xf32>
    %482 = arith.addf %481, %480 : vector<1x7xf32>
    %483 = arith.divf %481, %482 : vector<1x7xf32>
    %484 = arith.mulf %475, %426 : vector<1x7xf32>
    %485 = arith.mulf %469, %477 : vector<1x7xf32>
    %486 = arith.addf %484, %485 : vector<1x7xf32>
    %487 = math.tanh %486 : vector<1x7xf32>
    %488 = arith.mulf %483, %487 : vector<1x7xf32>
    %c0_92 = arith.constant 0 : index
    %c7 = arith.constant 7 : index
    %c0_93 = arith.constant 0 : index
    %489 = vector.load %arg8[%c0_92, %c7, %c0_93] : memref<1x8x7xf32, #tpu.memory_space<vmem>>, vector<1x1x7xf32>
    %490 = vector.shape_cast %489 : vector<1x1x7xf32> to vector<1x7xf32>
    %491 = vector.shape_cast %488 : vector<1x7xf32> to vector<1x1x7xf32>
    tpu.vector_store %arg8[%c0_92, %c7, %c0_93], %491 {strides = array<i32>} : memref<1x8x7xf32, #tpu.memory_space<vmem>>, vector<1x1x7xf32>,
    %c0_94 = arith.constant 0 : index
    %c0_95 = arith.constant 0 : index
    %c0_96 = arith.constant 0 : index
    %492 = vector.load %arg8[%c0_94, %c0_95, %c0_96] : memref<1x8x7xf32, #tpu.memory_space<vmem>>, vector<1x8x7xf32>
    %cst_97 = arith.constant dense<0xFF800000> : vector<1x8xf32>
    %493 = vector.multi_reduction <maximumf>, %492, %cst_97 [2] : vector<1x8x7xf32> to vector<1x8xf32>
    %494 = vector.shape_cast %493 : vector<1x8xf32> to vector<1x8x1xf32>
    %495 = vector.broadcast %494 : vector<1x8x1xf32> to vector<1x8x7xf32>
    %496 = arith.subf %492, %495 : vector<1x8x7xf32>
    %497 = math.exp %496 : vector<1x8x7xf32>
    %cst_98 = arith.constant dense<0.000000e+00> : vector<1x8xf32>
    %498 = vector.multi_reduction <add>, %497, %cst_98 [2] : vector<1x8x7xf32> to vector<1x8xf32>
    %499 = vector.shape_cast %498 : vector<1x8xf32> to vector<1x8x1xf32>
    %500 = tpu.reciprocal %499 {approx = true} : vector<1x8x1xf32> -> vector<1x8x1xf32>
    %501 = arith.mulf %499, %500 : vector<1x8x1xf32>
    %cst_99 = arith.constant 2.000000e+00 : f32
    %502 = vector.broadcast %cst_99 : f32 to vector<1x8x1xf32>
    %503 = arith.subf %502, %501 : vector<1x8x1xf32>
    %504 = arith.mulf %500, %503 : vector<1x8x1xf32>
    %505 = vector.broadcast %504 : vector<1x8x1xf32> to vector<1x8x7xf32>
    %506 = arith.mulf %497, %505 : vector<1x8x7xf32>
    %507 = vector.extract_strided_slice %506 {offsets = [0, 0, 1], sizes = [1, 8, 6], strides = [1, 1, 1]} : vector<1x8x7xf32> to vector<1x8x6xf32>
    "tpu.trace_start"() <{level = 10 : i32, message = "btl,btd->bld"}> : () -> ()
    %cst_100 = arith.constant dense<0.000000e+00> : vector<1x6x16xf32>
    %508 = tpu.matmul %507, %0, %cst_100 {dimension_numbers = #tpu.dot_dimension_numbers<[1], [1], [2], [2], [0, 0, 0, 2, 1, 2], [0], [0]>} : vector<1x8x6xf32>, vector<1x8x16xf32>, vector<1x6x16xf32> -> vector<1x6x16xf32>
    "tpu.trace_stop"() : () -> ()
    %c0_101 = arith.constant 0 : index
    %c0_102 = arith.constant 0 : index
    %c0_103 = arith.constant 0 : index
    %509 = vector.load %arg7[%c0_101, %c0_102, %c0_103] : memref<1x6x16xf32, #tpu.memory_space<vmem>>, vector<1x6x16xf32>
    tpu.vector_store %arg7[%c0_101, %c0_102, %c0_103], %508 {strides = array<i32>} : memref<1x6x16xf32, #tpu.memory_space<vmem>>, vector<1x6x16xf32>,
    return
  }
  func.func @transform_0(%arg0: i32) -> (i32, i32, i32) {
    %c0_i32 = arith.constant 0 : i32
    %c0_i32_0 = arith.constant 0 : i32
    %c0_i32_1 = arith.constant 0 : i32
    return %arg0, %c0_i32, %c0_i32_0 : i32, i32, i32
  }
  func.func @transform_1(%arg0: i32) -> (i32, i32) {
    %c0_i32 = arith.constant 0 : i32
    %c0_i32_0 = arith.constant 0 : i32
    %c0_i32_1 = arith.constant 0 : i32
    return %c0_i32, %c0_i32_0 : i32, i32
  }
  func.func @transform_2(%arg0: i32) -> (i32, i32) {
    %c0_i32 = arith.constant 0 : i32
    %c0_i32_0 = arith.constant 0 : i32
    %c0_i32_1 = arith.constant 0 : i32
    return %c0_i32, %c0_i32_0 : i32, i32
  }
  func.func @transform_3(%arg0: i32) -> (i32, i32) {
    %c0_i32 = arith.constant 0 : i32
    %c0_i32_0 = arith.constant 0 : i32
    %c0_i32_1 = arith.constant 0 : i32
    return %c0_i32, %c0_i32_0 : i32, i32
  }
  func.func @transform_4(%arg0: i32) -> (i32, i32) {
    %c0_i32 = arith.constant 0 : i32
    %c0_i32_0 = arith.constant 0 : i32
    %c0_i32_1 = arith.constant 0 : i32
    return %c0_i32, %c0_i32_0 : i32, i32
  }
  func.func @transform_5(%arg0: i32) -> (i32, i32) {
    %c0_i32 = arith.constant 0 : i32
    %c0_i32_0 = arith.constant 0 : i32
    %c0_i32_1 = arith.constant 0 : i32
    return %c0_i32, %c0_i32_0 : i32, i32
  }
  func.func @transform_6(%arg0: i32) -> (i32, i32, i32) {
    %c0_i32 = arith.constant 0 : i32
    %c0_i32_0 = arith.constant 0 : i32
    %c0_i32_1 = arith.constant 0 : i32
    return %arg0, %c0_i32, %c0_i32_0 : i32, i32, i32
  }
}

</mosaic_0001>

<bundles_post_ra>
// kernel: tpu_custom_call.1
= control target key start
LH: loop header
LB: loop body
LE: loop exit
PB: predicated region body
PF: predicated region fallthrough
CT: control target
= control target key end

     0   :  { %11 = vsyncpa [#allocation4], 0  ;;  %s3549_s0 = inlined_call_operand.hbm [shape: f32[2,8,16], index: 0, kind: input, shape index: {}]   ;;  %s3550_s1 = inlined_call_operand.hbm [shape: f32[16,28], index: 1, kind: input, shape index: {}]   ;;  %s3551_s2 = inlined_call_operand.hbm [shape: f32[7,28], index: 2, kind: input, shape index: {}]   ;;  %s3552_s3 = inlined_call_operand.vmem [shape: f32[1,28], index: 3, kind: input, shape index: {}]   ;;  %s3553_s4 = inlined_call_operand.hbm [shape: f32[14,28], index: 4, kind: input, shape index: {}]   ;;  %s3554_s5 = inlined_call_operand.vmem [shape: f32[1,28], index: 5, kind: input, shape index: {}]   ;;  %s3555_s6 = inlined_call_operand.vmem [shape: f32[2,6,16], index: 6, kind: output, shape index: {}]  }
   0x1   :  { %13 = vsyncpa [#allocation4 + $0x1], 0 }
   0x2   :  { %14 = vsyncpa [#allocation6], 0 }
   0x3   :  { %15 = vsyncpa [#allocation9], 0  ;;  %s3032_s21 = smov 0   ;;  %s3034_s22 = smov 0  }
   0x4   :  { %s3036_s23 = smov 0   ;;  %s3038_s24 = smov 0  }
   0x5 LB: > { %s3051_s25 = sadd.s32 4294967295, %s2980_s24   ;;  %p41_p0 = scmp.ne.s32.totalorder %s2972_s22, %s2968_s21  ;;  %s2980_s24 = sphi %s3038_s24, %s3575_s24   ;;  %s2976_s23 = sphi %s3036_s23, %s3574_s23   ;;  %s2972_s22 = sphi %s3034_s22, %s3573_s22   ;;  %s2968_s21 = sphi %s3032_s21, %s3572_s21  }
   0x6   : > { %p3556_p1 = scmp.eq.s32.totalorder %s3051_s25, 0  ;;  %p2358_p2 = scmp.ge.s32.totalorder %s2980_s24, 1 }
   0x7   : > { %p183_p3 = scmp.lt.s32.totalorder %s2980_s24, 3  ;;  %s2982_s28 = smov [#allocation5]  }
   0x8   : > { %p3059_p4 = por %p3556_p1, %p41_p0  ;;  %s195_s29 = sshll.u32 %s2982_s28, 4  ;;  %s3067_s29 = int_to_ptr.vmem [resolvable:$true] %s195_s29 }
   0x9   : > { %p3063_p5 = pnand %p2358_p2, %p183_p3  ;;  %s2983_s7 = smov [#allocation7]  }
   0xa   : > { %s3559_s26 = scalar_select %p3059_p4, 1, 0 }
   0xb   : > { %s3560_s27 = scalar_select %p3063_p5, 1, 0 }
   0xc   : > { %p2625_p6 = pneg %p3063_p5  ;;  %s209_s8 = sshll.u32 %s2983_s7, 4  ;;  %s3077_s8 = int_to_ptr.vmem [resolvable:$true] %s209_s8 }
   0xd   : > { %s2984_s9 = smov [#allocation8]   ;;  %s2824_s13 = scalar_lea.hbm %s3550_s1, 256 }
   0xe   : > { %p3073_p7 = pnand %p2625_p6, %p3556_p1  ;;  %s3079_s10 = sshll.u32 %s2984_s9, 4  ;;  %s223_s10 = int_to_ptr.vmem [resolvable:$true] %s3079_s10 }
   0xf   : > { %p2825_p8 = scmp.ne.s32.totalorder %s3550_s1, %s2824_s13  ;;  %p2831_p12 = scmp.lt.u32.totalorder %s2824_s13, %s3550_s1 }
  0x10   : > { %p3089_p9 = pneg %p3073_p7 }
  0x12   : > { %p2827_p10 = pnand %p3089_p9, %p2825_p8 }
  0x14   : > { %p2828_p11 = pneg %p2827_p10 }
  0x16   : > { %p2833_p13 = pnand %p2831_p12, %p2828_p11 }
  0x18   : > { %2836 = shalt.err (!%p2833_p13)
}
  0x19   : > { %s2837_s19 = scalar_lea.vmem %s3067_s29, 256  ;;  %p2845_p6 = scmp.lt.s32.totalorder %s3067_s29, %s3067_s29 }
  0x1a   : > { %p2838_p0 = scmp.ne.s32.totalorder %s3067_s29, %s2837_s19  ;;  %p2846_p1 = scmp.lt.s32.totalorder %s2837_s19, %s2837_s19 }
  0x1c   : > { %p2840_p2 = pnand %p2838_p0, %p3089_p9  ;;  %p2847_p8 = por %p2846_p1, %p2845_p6 }
  0x1e   : > { %p2841_p3 = pneg %p2840_p2 }
  0x20   : > { %p2848_p10 = pnand %p2847_p8, %p2841_p3 }
  0x22   : > { %2851 = shalt.err (!%p2848_p10)
}
  0x23   : > { %s2985_s20 = smov 128   ;;  %s2986_s21 = smov 8  }
  0x24   : > { %2628 = dma.hbm_to_vmem [thread:$0]  (!%p3073_p7), %s3550_s1, 256, %s3067_s29, [#allocation6], %s2985_s20, %s2985_s20, %s2986_s21  }
  0x25   : > { %s2852_s12 = scalar_lea.hbm %s3551_s2, 128 }
  0x26   : > { %p2853_p1 = scmp.ne.s32.totalorder %s3551_s2, %s2852_s12  ;;  %p2859_p13 = scmp.lt.u32.totalorder %s2852_s12, %s3551_s2 }
  0x28   : > { %p2855_p11 = pnand %p2853_p1, %p3089_p9 }
  0x2a   : > { %p2856_p12 = pneg %p2855_p11 }
  0x2c   : > { %p2861_p0 = pnand %p2859_p13, %p2856_p12 }
  0x2e   : > { %2864 = shalt.err (!%p2861_p0)
}
  0x2f   : > { %s2865_s29 = scalar_lea.vmem %s3077_s8, 128  ;;  %p2873_p8 = scmp.lt.s32.totalorder %s3077_s8, %s3077_s8 }
  0x30   : > { %p2866_p2 = scmp.ne.s32.totalorder %s3077_s8, %s2865_s29  ;;  %p2874_p10 = scmp.lt.s32.totalorder %s2865_s29, %s2865_s29 }
  0x32   : > { %p2868_p3 = pnand %p2866_p2, %p3089_p9  ;;  %p2875_p1 = por %p2874_p10, %p2873_p8 }
  0x34   : > { %p2869_p6 = pneg %p2868_p3 }
  0x36   : > { %p2876_p11 = pnand %p2875_p1, %p2869_p6 }
  0x38   : > { %2879 = shalt.err (!%p2876_p11)
}
  0x39   : > { %2631 = dma.hbm_to_vmem [thread:$0]  (!%p3073_p7), %s3551_s2, 128, %s3077_s8, [#allocation6]  }
  0x3a   : > { %s2880_s9 = scalar_lea.hbm %s3553_s4, 256 }
  0x3b   : > { %p2881_p12 = scmp.ne.s32.totalorder %s3553_s4, %s2880_s9  ;;  %p2887_p2 = scmp.lt.u32.totalorder %s2880_s9, %s3553_s4 }
  0x3d   : > { %p2883_p13 = pnand %p2881_p12, %p3089_p9 }
  0x3f   : > { %p2884_p0 = pneg %p2883_p13 }
  0x41   : > { %p2889_p3 = pnand %p2887_p2, %p2884_p0 }
  0x43   : > { %2892 = shalt.err (!%p2889_p3)
}
  0x44   : > { %s2893_s15 = scalar_lea.vmem %s223_s10, 256  ;;  %p2901_p1 = scmp.lt.s32.totalorder %s223_s10, %s223_s10 }
  0x45   : > { %p2894_p6 = scmp.ne.s32.totalorder %s223_s10, %s2893_s15  ;;  %p2902_p11 = scmp.lt.s32.totalorder %s2893_s15, %s2893_s15 }
  0x47   : > { %p2896_p8 = pnand %p2894_p6, %p3089_p9  ;;  %p2903_p4 = por %p2902_p11, %p2901_p1 }
  0x49   : > { %p2897_p10 = pneg %p2896_p8 }
  0x4b   : > { %p2904_p5 = pnand %p2903_p4, %p2897_p10 }
  0x4d   : > { %2907 = shalt.err (!%p2904_p5)
}
  0x4e   : > { %2634 = dma.hbm_to_vmem [thread:$0]  (!%p3073_p7), %s3553_s4, 256, %s223_s10, [#allocation9], %s2985_s20, %s2985_s20, %s2986_s21  }
  0x4f   : > { %s3159_s16 = sadd.s32 1, %s2980_s24   ;;  %s28_s29 = sadd.s32 1, %s2976_s23 }
  0x50   : > { %s25_s30 = ssub.s32 %s2980_s24, %s3159_s16  ;;  %p35_p5 = scmp.ne.s32.totalorder %s2976_s23, %s2972_s22 }
  0x51   : > { %p26_p4 = scmp.eq.s32.totalorder %s25_s30, 0  ;;  %p36_p9 = scmp.eq.s32.totalorder %s2980_s24, 0 }
  0x52   : > { %p2642_p12 = scmp.lt.s32.totalorder %s2980_s24, 2  ;;  %s239_s19 = sand.u32 1, %s2976_s23  }
  0x53   : > { %s3169_s18 = scalar_select %p26_p4, %s2976_s23, %s28_s29  }
  0x54   : > { %p37_p13 = por %p36_p9, %p35_p5  ;;  %s2363_s28 = sshll.u32 %s239_s19, 3 }
  0x55   : > { %s2364_s7 = sshll.u32 %s2980_s24, 7  ;;  %s243_s10 = scalar_lea.vmem [#allocation3], %s2363_s28 }
  0x56   : > { %s3176_s12 = scalar_lea.hbm %s3549_s0, %s2364_s7  ;;  %s250_s20 = sshll.u32 %s243_s10, 4  ;;  %s3178_s20 = int_to_ptr.vmem [resolvable:$true] %s250_s20 }
  0x57   : > { %p3180_p7 = pnand %p2642_p12, %p37_p13  ;;  %s240_s24 = scalar_lea.sflag [#allocation4], %s239_s19 }
  0x58   : > { %s2908_s13 = scalar_lea.hbm %s3176_s12, 128  ;;  %s2913_s8 = scalar_lea.hbm %s3549_s0, 256 }
  0x59   : > { %p2909_p0 = scmp.ne.s32.totalorder %s3176_s12, %s2908_s13  ;;  %p2910_p2 = pneg %p3180_p7 }
  0x5a   : > { %p2914_p8 = scmp.lt.u32.totalorder %s3176_s12, %s3549_s0  ;;  %p2915_p10 = scmp.lt.u32.totalorder %s2913_s8, %s2908_s13 }
  0x5b   : > { %p2911_p3 = pnand %p2910_p2, %p2909_p0  ;;  %p2917_p11 = scmp.lt.u32.totalorder %s2908_s13, %s3176_s12 }
  0x5c   : > { %p2916_p1 = por %p2915_p10, %p2914_p8 }
  0x5d   : > { %p2912_p6 = pneg %p2911_p3 }
  0x5e   : > { %p2918_p4 = por %p2917_p11, %p2916_p1 }
  0x60   : > { %p2919_p5 = pnand %p2918_p4, %p2912_p6 }
  0x62   : > { %2922 = shalt.err (!%p2919_p5)
}
  0x63   : > { %s2923_s29 = scalar_lea.vmem %s3178_s20, 128  ;;  %s2987_s19 = smov [#allocation3]  }
  0x64   : > { %p2924_p9 = scmp.ne.s32.totalorder %s3178_s20, %s2923_s29  ;;  %s2928_s28 = sshll.u32 %s2987_s19, 4  ;;  %s2929_s28 = int_to_ptr.vmem [resolvable:$false] %s2928_s28 }
  0x65   : > { %s2930_s7 = scalar_lea.vmem %s2929_s28, 256  ;;  %p2931_p0 = scmp.lt.s32.totalorder %s3178_s20, %s2929_s28 }
  0x66   : > { %p2926_p12 = pnand %p2924_p9, %p2910_p2  ;;  %p2932_p3 = scmp.lt.s32.totalorder %s2930_s7, %s2923_s29 }
  0x68   : > { %p2927_p13 = pneg %p2926_p12  ;;  %p2933_p8 = por %p2932_p3, %p2931_p0 }
  0x6a   : > { %p2934_p10 = pnand %p2933_p8, %p2927_p13 }
  0x6c   : > { %2937 = shalt.err (!%p2934_p10)
}
  0x6d   : > { %2638 = dma.hbm_to_vmem [thread:$0]  (!%p3180_p7), %s3176_s12, 128, %s3178_s20, %s240_s24  }
  0x6e   : > { %p3564_p6 = scmp.ne.s32.totalorder %s3560_s27, 0 }
  0x6f   : > { %s261_s9 = sand.u32 (!%p3564_p6), 1, %s2972_s22   ;;  %p3565_p2 = scmp.ne.s32.totalorder (!%p3564_p6), %s3559_s26, 0 }
  0x70   : > { %259 = sbr.rel (%p3564_p6) target bundleno = 7278 (0x1c6e), region = 44  ;;  %s2366_s11 = sshll.u32 (!%p3564_p6), %s261_s9, 3 }
  0x71   : > { %s262_s10 = scalar_lea.sflag (!%p3564_p6), [#allocation4], %s261_s9  ;;  %s265_s13 = scalar_lea.vmem (!%p3564_p6), [#allocation3], %s2366_s11 }
  0x77   : > { %2955 = dma.done.wait (%p3565_p2), %s262_s10, 128  }
  0x78   : > { %2957 = vsyncadd (%p3565_p2), %s262_s10, 4294967168  ;;  %p3566_p1 = scmp.eq.s32.totalorder %s3051_s25, 0 }
  0x7a   : > { %2959 = dma.done.wait (%p3566_p1), [#allocation6], 384   ;;  %p3567_p11 = pmov %p3566_p1 }
  0x7b   : > { %p3568_p7 = pmov %p3566_p1 }
  0x7c   : > { %2961 = vsyncadd (%p3567_p11), [#allocation6], 4294966912 }
  0x7d   : > { %2963 = dma.done.wait (%p3568_p7), [#allocation9], 256   ;;  %p3569_p4 = pmov %p3566_p1 }
  0x7e   : > { %v2988_v0 = vmov 0.0|0.0   ;;  %vm2989_vm0 = vmmov 0   ;;  %v2990_v1 = vmov 0.0   ;;  %vm401_vm1 = vcmask 1046528   ;;  %v310_v2 = vld [vmem:[#allocation5] sm:$0xff]  ;;  %v311_v3 = vld [vmem:[#allocation5 + $0x8] sm:$0xff] }
  0x7f   : > { %2965 = vsyncadd (%p3569_p4), [#allocation9], 4294967040  ;;  %2576 = vmatprep.subr.bf16.mxu0 %v2988_v0  ;;  %2472 = vmatprep.mubr.msk.f32.mxu0 %vm2989_vm0, %v2990_v1  ;;  %v2577_v4 = vpack.c.bf16 %v311_v3, %v310_v2  ;;  %v3230_v5 = vld [vmem:[#allocation7] sm:$0x7f]  ;;  %vm323_vm2 = vcmask 130048   ;;  %s2991_s12 = smov 114  }
  0x80   : > { %2475 = vmatprep.subr.mxu1 %v2990_v1  ;;  %2477 = vmatprep.mubr.msk.f32.mxu1 %vm2989_vm0, %v2990_v1  ;;  %v3234_v6 = vld [vmem:[%s265_s13] sm:$0xff]  ;;  %v2371_v8 = vld [vmem:[%s3552_s3] ss:$0 sm:$0xff]  ;;  %s2992_s20 = smov 7   ;;  %v314_v25 = vld [vmem:[#allocation8 + $0x8] sm:$0x3f] }
  0x81   : > { %2476 = vmatpush3.msk.msra.mxu1 %vm401_vm1, %v3230_v5  ;;  %2578 = vmatpush3.bf16.msra.mxu0 %v2577_v4  ;;  %v313_v24 = vld [vmem:[#allocation8] sm:$0xff]  ;;  %vm509_vm3 = vcmask 1045504   ;;  %vm2993_vm4 = vmmov 1   ;;  %s2994_s21 = smov 14   ;;  %s2995_s24 = smov 107   ;;  %vm397_vm6 = vcmask 56320  }
  0x82   : > { %2478 = vmatmul.mubr.f32.vlgmr.msra.gmra.mrb[0].mxu1 %v2990_v1  ;;  %2487 = vmatprep.subr.mxu0 %v2990_v1  ;;  %v3258_v26 = vpack.c.bf16 %v314_v25, %v313_v24  ;;  %vm3260_vm5 = vmpackc.low %vm509_vm3, %vm2993_vm4  ;;  %vm505_vm7 = vcmask 113664   ;;  %v3287_v33 = vld [vmem:[%s3554_s5] sm:$0x1]  ;;  %vm611_vm8 = vcmask 49152   ;;  %s2996_s8 = smov 127   ;;  %vm2187_vm9 = vcmask 64512  }
  0x83   : > { %2579 = vmatprep.subr.bf16.mxu1 %v2988_v0  ;;  %2484 = vmatprep.mubr.msk.f32.mxu1 %vm2989_vm0, %v2990_v1  ;;  %p305_p5 = scmp.lt.s32.totalorder %s3051_s25, 1  ;;  %vm2261_vm10 = vcmask 128000  }
  0x84   : > { %2473 = vmatmul.mubr.msk.f32.vlgmr.msra.gmra.mrb[0].mxu0 %vm323_vm2, %v3234_v6  ;;  %2582 = vmatpush3.bf16.msk.msra.mxu1 %vm3260_vm5, %v3258_v26 }
  0x85   : > { %2488 = vmatpush3.msk.msra.mxu0 %vm401_vm1, %v3230_v5  ;;  %2489 = vmatprep.mubr.msk.f32.mxu0 %vm2989_vm0, %v2990_v1  ;;  %s3577_s25 = smov (!%p305_p5, %s3051_s25), 1 }
  0x86   : > { %2499 = vmatprep.subr.mxu0 %v2990_v1  ;;  %2583 = vmatprep.subr.bf16.mxu1 %v2988_v0  ;;  %s2370_s17 = sshll.u32 %s3577_s25, 3 }
  0x87   : > { %s308_s19 = scalar_lea.vmem %s3555_s6, %s2370_s17 }
 0x155   : > { %v471_v7 = vpop.f32.mrb[0].mxu1 }
 0x156   : > { %v2479_v9 = vpop.f32.mrb[1].mxu1 }
 0x157   : > { %v393_v10 = vpop.f32.mrb[0].mxu0 }
 0x158   : > { %v3250_v11 = vadd.f32 %v2371_v8, %v393_v10  ;;  %v2474_v12 = vpop.f32.mrb[1].mxu0 }
 0x15a   : > { %v475_v13 = vadd.f32 %v471_v7, %v3250_v11 }
 0x15c   : > { %2692 = vtanh.f32 %v475_v13  ;;  %v2374_v15 = vmul.f32 -1.442695, %v475_v13 }
 0x15e   : > { %2694 = vpow2.f32 %v2374_v15 }
 0x166   : > { %v2693_v14 = vpop.eup %2692 }
 0x167   : > { %485 = vrot.lane.b32.xlu0 %v2693_v14, %s2991_s12 }
 0x168   : > { %v2695_v16 = vpop.eup %2694 }
 0x169   : > { %v479_v17 = vadd.f32 1.0, %v2695_v16 }
 0x16b   : > { %2696 = vrcp.f32 %v479_v17 }
 0x175   : > { %v2697_v18 = vpop.eup %2696 }
 0x176   : > { %v483_v21 = vmul.f32 0.0, %v2697_v18 }
 0x1d9   : > { %v486_v19 = vpop.permute.xlu0 %485 }
 0x1da   : > { %v488_v20 = vmul.f32 %v2697_v18, %v486_v19 }
 0x1dc   : > { %490 = vrot.lane.b32.xlu0 %v488_v20, %s2992_s20 }
 0x24e   : > { %v491_v22 = vpop.permute.xlu0 %490 }
 0x24f   : > { %v3255_v23 = vadd.f32 %v491_v22, %v483_v21 }
 0x251   : > { %2698 = vtanh.f32 %v3255_v23  ;;  %v697_v55 = vrot.slane %v3255_v23, 7 }
 0x25b   : > { %v2699_v28 = vpop.eup %2698 }
 0x25c   : > { %496 = vrot.lane.b32.xlu1 %v2699_v28, %s2994_s21 }
 0x2ce   : > { %v497_v29 = vpop.permute.xlu1 %496 }
 0x2cf   : > { %v499_v30 = vmul.f32 %v2697_v18, %v497_v29 }
 0x2d1   : > { %501 = vrot.lane.b32.xlu1 %v499_v30, %s2995_s24 }
 0x343   : > { %v502_v31 = vpop.permute.xlu1 %501 }
 0x344   : > { %v504_v32 = vsel %vm397_vm6, %v502_v31, 0.0  ;;  %2490 = vmatmul.mubr.msk.f32.vlgmr.msra.gmra.mrb[2].mxu0 %vm397_vm6, %v502_v31 }
 0x345   : > { %2485 = vmatmul.mubr.msk.f32.vlgmr.msra.gmra.mrb[2].mxu1 %vm505_vm7, %v504_v32  ;;  %2500 = vmatpush3.msk.msra.mxu0 %vm401_vm1, %v3230_v5 }
 0x346   : > { %2586 = vmatpush3.bf16.msk.msra.mxu1 %vm3260_vm5, %v3258_v26  ;;  %2496 = vmatprep.mubr.msk.f32.mxu1 %vm2989_vm0, %v2990_v1 }
 0x347   : > { %2501 = vmatprep.mubr.msk.f32.mxu0 %vm2989_vm0, %v2990_v1  ;;  %2587 = vmatprep.subr.bf16.mxu1 %v2988_v0 }
 0x348   : > { %2511 = vmatprep.subr.mxu0 %v2990_v1 }
 0x417   : > { %v681_v34 = vpop.f32.mrb[2].mxu0 }
 0x418   : > { %v686_v35 = vrot.slane %v681_v34, 7  ;;  %v579_v36 = vpop.f32.mrb[2].mxu1  ;;  %v2491_v37 = vpop.f32.mrb[3].mxu0 }
 0x419   : > { %v580_v38 = vadd.f32 %v579_v36, %v3287_v33  ;;  %v2486_v39 = vpop.f32.mrb[3].mxu1 }
 0x41a   : > { %v688_v40 = vadd.f32 %v686_v35, %v3250_v11 }
 0x41b   : > { %2700 = vtanh.f32 %v580_v38  ;;  %v2377_v43 = vmul.f32 -1.442695, %v580_v38 }
 0x41c   : > { %2702 = vtanh.f32 %v688_v40  ;;  %v2380_v44 = vmul.f32 -1.442695, %v688_v40 }
 0x41d   : > { %2704 = vpow2.f32 %v2377_v43 }
 0x41e   : > { %2706 = vpow2.f32 %v2380_v44 }
 0x425   : > { %v2701_v41 = vpop.eup %2700 }
 0x426   : > { %v2703_v42 = vpop.eup %2702  ;;  %592 = vrot.lane.b32.xlu0 %v2701_v41, %s2991_s12 }
 0x427   : > { %701 = vrot.lane.b32.xlu1 %v2703_v42, %s2991_s12  ;;  %v2705_v45 = vpop.eup %2704 }
 0x428   : > { %v2707_v46 = vpop.eup %2706  ;;  %v586_v47 = vadd.f32 1.0, %v2705_v45 }
 0x429   : > { %v692_v48 = vadd.f32 1.0, %v2707_v46 }
 0x42a   : > { %2708 = vrcp.f32 %v586_v47 }
 0x42b   : > { %2710 = vrcp.f32 %v692_v48 }
 0x434   : > { %v2709_v49 = vpop.eup %2708 }
 0x435   : > { %v2711_v51 = vpop.eup %2710  ;;  %v590_v56 = vmul.f32 0.0, %v2709_v49 }
 0x436   : > { %v699_v58 = vmul.f32 %v2711_v51, %v697_v55 }
 0x498   : > { %v593_v50 = vpop.permute.xlu0 %592 }
 0x499   : > { %v595_v52 = vmul.f32 %v2709_v49, %v593_v50  ;;  %v702_v53 = vpop.permute.xlu1 %701 }
 0x49a   : > { %v704_v54 = vmul.f32 %v2711_v51, %v702_v53 }
 0x49b   : > { %597 = vrot.lane.b32.xlu0 %v595_v52, %s2992_s20 }
 0x49c   : > { %706 = vrot.lane.b32.xlu1 %v704_v54, %s2992_s20 }
 0x50d   : > { %v598_v57 = vpop.permute.xlu0 %597 }
 0x50e   : > { %v600_v59 = vadd.f32 %v598_v57, %v590_v56  ;;  %v707_v60 = vpop.permute.xlu1 %706 }
 0x50f   : > { %v3296_v61 = vadd.f32 %v707_v60, %v699_v58 }
 0x510   : > { %2712 = vtanh.f32 %v600_v59 }
 0x511   : > { %2714 = vtanh.f32 %v3296_v61  ;;  %v915_v41 = vrot.slane %v3296_v61, 7 }
 0x51a   : > { %v2713_v62 = vpop.eup %2712 }
 0x51b   : > { %v2715_v63 = vpop.eup %2714  ;;  %603 = vrot.lane.b32.xlu0 %v2713_v62, %s2994_s21 }
 0x51c   : > { %712 = vrot.lane.b32.xlu1 %v2715_v63, %s2994_s21 }
 0x58d   : > { %v604_v2 = vpop.permute.xlu0 %603 }
 0x58e   : > { %v3301_v3 = vmul.f32 %v2709_v49, %v604_v2  ;;  %v713_v4 = vpop.permute.xlu1 %712 }
 0x58f   : > { %v715_v7 = vmul.f32 %v2711_v51, %v713_v4 }
 0x590   : > { %v720_v8 = vrot.slane %v3301_v3, 7 }
 0x591   : > { %717 = vrot.lane.b32.xlu0 %v715_v7, %s2995_s24  ;;  %v828_v9 = vrot.slane %v715_v7, 1 }
 0x592   : > { %721 = vrot.lane.b32.xlu1 %v720_v8, %s2991_s12 }
 0x595   : > { %829 = vrot.lane.b32.xlu0 %v828_v9, %s2995_s24 }
 0x603   : > { %v718_v10 = vpop.permute.xlu0 %717 }
 0x604   : > { %v722_v12 = vpop.permute.xlu1 %721 }
 0x605   : > { %v724_v13 = vsel %vm397_vm6, %v718_v10, %v722_v12 }
 0x606   : > { %v726_v14 = vrot.slane %v724_v13, 1 }
 0x607   : > { %v830_v15 = vpop.permute.xlu0 %829 }
 0x608   : > { %2497 = vmatmul.mubr.msk.f32.vlgmr.msra.gmra.mrb[4].mxu1 %vm505_vm7, %v726_v14  ;;  %2502 = vmatmul.mubr.msk.f32.vlgmr.msra.gmra.mrb[4].mxu0 %vm397_vm6, %v830_v15 }
 0x609   : > { %2590 = vmatpush3.bf16.msk.msra.mxu1 %vm3260_vm5, %v3258_v26  ;;  %2512 = vmatpush3.msk.msra.mxu0 %vm401_vm1, %v3230_v5 }
 0x60a   : > { %2508 = vmatprep.mubr.msk.f32.mxu1 %vm2989_vm0, %v2990_v1  ;;  %2513 = vmatprep.mubr.msk.f32.mxu0 %vm2989_vm0, %v2990_v1 }
 0x60b   : > { %2591 = vmatprep.subr.bf16.mxu1 %v2988_v0  ;;  %2523 = vmatprep.subr.mxu0 %v2990_v1 }
 0x6db   : > { %v795_v16 = vpop.f32.mrb[4].mxu1  ;;  %v899_v17 = vpop.f32.mrb[4].mxu0 }
 0x6dc   : > { %v796_v18 = vadd.f32 %v795_v16, %v3287_v33  ;;  %v904_v19 = vrot.slane %v899_v17, 6  ;;  %v2498_v20 = vpop.f32.mrb[5].mxu1  ;;  %v2503_v21 = vpop.f32.mrb[5].mxu0 }
 0x6de   : > { %2716 = vtanh.f32 %v796_v18  ;;  %v906_v22 = vadd.f32 %v904_v19, %v3250_v11  ;;  %v2383_v25 = vmul.f32 -1.442695, %v796_v18 }
 0x6e0   : > { %2718 = vtanh.f32 %v906_v22  ;;  %v2386_v28 = vmul.f32 -1.442695, %v906_v22 }
 0x6e1   : > { %2720 = vpow2.f32 %v2383_v25 }
 0x6e2   : > { %2722 = vpow2.f32 %v2386_v28 }
 0x6e8   : > { %v2717_v23 = vpop.eup %2716 }
 0x6e9   : > { %808 = vrot.lane.b32.xlu1 %v2717_v23, %s2991_s12 }
 0x6ea   : > { %v2719_v24 = vpop.eup %2718 }
 0x6eb   : > { %919 = vrot.lane.b32.xlu0 %v2719_v24, %s2991_s12  ;;  %v2721_v29 = vpop.eup %2720 }
 0x6ec   : > { %v2723_v30 = vpop.eup %2722  ;;  %v802_v31 = vadd.f32 1.0, %v2721_v29 }
 0x6ed   : > { %v910_v32 = vadd.f32 1.0, %v2723_v30 }
 0x6ee   : > { %2724 = vrcp.f32 %v802_v31 }
 0x6ef   : > { %2726 = vrcp.f32 %v910_v32 }
 0x6f8   : > { %v2725_v34 = vpop.eup %2724 }
 0x6f9   : > { %v2727_v37 = vpop.eup %2726  ;;  %v806_v40 = vmul.f32 %v2725_v34, %v600_v59 }
 0x6fa   : > { %v917_v44 = vmul.f32 %v2727_v37, %v915_v41 }
 0x75b   : > { %v809_v35 = vpop.permute.xlu1 %808 }
 0x75c   : > { %v811_v36 = vmul.f32 %v2725_v34, %v809_v35 }
 0x75d   : > { %v920_v38 = vpop.permute.xlu0 %919 }
 0x75e   : > { %813 = vrot.lane.b32.xlu1 %v811_v36, %s2992_s20  ;;  %v922_v39 = vmul.f32 %v2727_v37, %v920_v38 }
 0x760   : > { %924 = vrot.lane.b32.xlu0 %v922_v39, %s2992_s20 }
 0x7d0   : > { %v814_v42 = vpop.permute.xlu1 %813 }
 0x7d1   : > { %v3328_v43 = vadd.f32 %v814_v42, %v806_v40 }
 0x7d2   : > { %v925_v45 = vpop.permute.xlu0 %924 }
 0x7d3   : > { %2728 = vtanh.f32 %v3328_v43  ;;  %v3331_v46 = vadd.f32 %v925_v45, %v917_v44 }
 0x7d5   : > { %2730 = vtanh.f32 %v3331_v46  ;;  %v1133_v24 = vrot.slane %v3331_v46, 7 }
 0x7dd   : > { %v2729_v47 = vpop.eup %2728 }
 0x7de   : > { %819 = vrot.lane.b32.xlu1 %v2729_v47, %s2994_s21 }
 0x7df   : > { %v2731_v48 = vpop.eup %2730 }
 0x7e0   : > { %930 = vrot.lane.b32.xlu0 %v2731_v48, %s2994_s21 }
 0x850   : > { %v820_v49 = vpop.permute.xlu1 %819 }
 0x851   : > { %v3336_v50 = vmul.f32 %v2725_v34, %v820_v49 }
 0x852   : > { %v931_v52 = vpop.permute.xlu0 %930 }
 0x853   : > { %v938_v51 = vrot.slane %v3336_v50, 6  ;;  %v933_v53 = vmul.f32 %v2727_v37, %v931_v52 }
 0x855   : > { %939 = vrot.lane.b32.xlu0 %v938_v51, %s2991_s12  ;;  %935 = vrot.lane.b32.xlu1 %v933_v53, %s2995_s24  ;;  %v1046_v54 = vrot.slane %v933_v53, 2 }
 0x859   : > { %1047 = vrot.lane.b32.xlu1 %v1046_v54, %s2995_s24 }
 0x8c7   : > { %v940_v55 = vpop.permute.xlu0 %939  ;;  %v936_v56 = vpop.permute.xlu1 %935 }
 0x8c8   : > { %v942_v57 = vsel %vm397_vm6, %v936_v56, %v940_v55 }
 0x8c9   : > { %v944_v58 = vrot.slane %v942_v57, 2 }
 0x8cb   : > { %v1048_v59 = vpop.permute.xlu1 %1047  ;;  %2509 = vmatmul.mubr.msk.f32.vlgmr.msra.gmra.mrb[6].mxu1 %vm505_vm7, %v944_v58 }
 0x8cc   : > { %2514 = vmatmul.mubr.msk.f32.vlgmr.msra.gmra.mrb[6].mxu0 %vm397_vm6, %v1048_v59  ;;  %2594 = vmatpush3.bf16.msk.msra.mxu1 %vm3260_vm5, %v3258_v26 }
 0x8cd   : > { %2524 = vmatpush3.msk.msra.mxu0 %vm401_vm1, %v3230_v5  ;;  %2520 = vmatprep.mubr.msk.f32.mxu1 %vm2989_vm0, %v2990_v1 }
 0x8ce   : > { %2525 = vmatprep.mubr.msk.f32.mxu0 %vm2989_vm0, %v2990_v1  ;;  %2595 = vmatprep.subr.bf16.mxu1 %v2988_v0 }
 0x8cf   : > { %2535 = vmatprep.subr.mxu0 %v2990_v1 }
 0x99e   : > { %v1013_v60 = vpop.f32.mrb[6].mxu1 }
 0x99f   : > { %v1014_v61 = vadd.f32 %v1013_v60, %v3287_v33  ;;  %v2510_v62 = vpop.f32.mrb[7].mxu1  ;;  %v1117_v63 = vpop.f32.mrb[6].mxu0 }
 0x9a0   : > { %v1122_v2 = vrot.slane %v1117_v63, 5  ;;  %v2515_v4 = vpop.f32.mrb[7].mxu0 }
 0x9a1   : > { %2732 = vtanh.f32 %v1014_v61  ;;  %v2389_v10 = vmul.f32 -1.442695, %v1014_v61 }
 0x9a2   : > { %v1124_v7 = vadd.f32 %v1122_v2, %v3250_v11 }
 0x9a4   : > { %2734 = vtanh.f32 %v1124_v7  ;;  %v2392_v12 = vmul.f32 -1.442695, %v1124_v7 }
 0x9a5   : > { %2736 = vpow2.f32 %v2389_v10 }
 0x9a6   : > { %2738 = vpow2.f32 %v2392_v12 }
 0x9ab   : > { %v2733_v8 = vpop.eup %2732 }
 0x9ac   : > { %1026 = vrot.lane.b32.xlu0 %v2733_v8, %s2991_s12 }
 0x9ae   : > { %v2735_v9 = vpop.eup %2734 }
 0x9af   : > { %1137 = vrot.lane.b32.xlu1 %v2735_v9, %s2991_s12  ;;  %v2737_v13 = vpop.eup %2736 }
 0x9b0   : > { %v2739_v14 = vpop.eup %2738  ;;  %v1020_v15 = vadd.f32 1.0, %v2737_v13 }
 0x9b1   : > { %v1128_v16 = vadd.f32 1.0, %v2739_v14 }
 0x9b2   : > { %2740 = vrcp.f32 %v1020_v15 }
 0x9b3   : > { %2742 = vrcp.f32 %v1128_v16 }
 0x9bc   : > { %v2741_v17 = vpop.eup %2740 }
 0x9bd   : > { %v2743_v20 = vpop.eup %2742  ;;  %v1024_v23 = vmul.f32 %v2741_v17, %v3328_v43 }
 0x9be   : > { %v1135_v29 = vmul.f32 %v2743_v20, %v1133_v24 }
 0xa1e   : > { %v1027_v18 = vpop.permute.xlu0 %1026 }
 0xa1f   : > { %v1029_v19 = vmul.f32 %v2741_v17, %v1027_v18 }
 0xa21   : > { %1031 = vrot.lane.b32.xlu0 %v1029_v19, %s2992_s20  ;;  %v1138_v21 = vpop.permute.xlu1 %1137 }
 0xa22   : > { %v1140_v22 = vmul.f32 %v2743_v20, %v1138_v21 }
 0xa24   : > { %1142 = vrot.lane.b32.xlu1 %v1140_v22, %s2992_s20 }
 0xa93   : > { %v1032_v25 = vpop.permute.xlu0 %1031 }
 0xa94   : > { %v3364_v28 = vadd.f32 %v1032_v25, %v1024_v23 }
 0xa96   : > { %2744 = vtanh.f32 %v3364_v28  ;;  %v1143_v30 = vpop.permute.xlu1 %1142 }
 0xa97   : > { %v3367_v31 = vadd.f32 %v1143_v30, %v1135_v29 }
 0xa99   : > { %2746 = vtanh.f32 %v3367_v31  ;;  %v1351_v10 = vrot.slane %v3367_v31, 7 }
 0xaa0   : > { %v2745_v32 = vpop.eup %2744 }
 0xaa1   : > { %1037 = vrot.lane.b32.xlu0 %v2745_v32, %s2994_s21 }
 0xaa3   : > { %v2747_v34 = vpop.eup %2746 }
 0xaa4   : > { %1148 = vrot.lane.b32.xlu1 %v2747_v34, %s2994_s21 }
 0xb13   : > { %v1038_v35 = vpop.permute.xlu0 %1037 }
 0xb14   : > { %v3372_v36 = vmul.f32 %v2741_v17, %v1038_v35 }
 0xb16   : > { %v1156_v37 = vrot.slane %v3372_v36, 5  ;;  %v1149_v38 = vpop.permute.xlu1 %1148 }
 0xb17   : > { %v1151_v39 = vmul.f32 %v2743_v20, %v1149_v38 }
 0xb18   : > { %1157 = vrot.lane.b32.xlu1 %v1156_v37, %s2991_s12 }
 0xb19   : > { %1153 = vrot.lane.b32.xlu0 %v1151_v39, %s2995_s24  ;;  %v1264_v40 = vrot.slane %v1151_v39, 3 }
 0xb1d   : > { %1265 = vrot.lane.b32.xlu0 %v1264_v40, %s2995_s24 }
 0xb8a   : > { %v1158_v41 = vpop.permute.xlu1 %1157 }
 0xb8b   : > { %v1154_v42 = vpop.permute.xlu0 %1153 }
 0xb8c   : > { %v1160_v43 = vsel %vm397_vm6, %v1154_v42, %v1158_v41 }
 0xb8d   : > { %v1162_v44 = vrot.slane %v1160_v43, 3 }
 0xb8f   : > { %v1266_v45 = vpop.permute.xlu0 %1265  ;;  %2521 = vmatmul.mubr.msk.f32.vlgmr.msra.gmra.mrb[8].mxu1 %vm505_vm7, %v1162_v44 }
 0xb90   : > { %2526 = vmatmul.mubr.msk.f32.vlgmr.msra.gmra.mrb[8].mxu0 %vm397_vm6, %v1266_v45  ;;  %2598 = vmatpush3.bf16.msk.msra.mxu1 %vm3260_vm5, %v3258_v26 }
 0xb91   : > { %2536 = vmatpush3.msk.msra.mxu0 %vm401_vm1, %v3230_v5  ;;  %2532 = vmatprep.mubr.msk.f32.mxu1 %vm2989_vm0, %v2990_v1 }
 0xb92   : > { %2537 = vmatprep.mubr.msk.f32.mxu0 %vm2989_vm0, %v2990_v1  ;;  %2599 = vmatprep.subr.bf16.mxu1 %v2988_v0 }
 0xb93   : > { %2547 = vmatprep.subr.mxu0 %v2990_v1 }
 0xc62   : > { %v1231_v46 = vpop.f32.mrb[8].mxu1 }
 0xc63   : > { %v1232_v47 = vadd.f32 %v1231_v46, %v3287_v33  ;;  %v2522_v48 = vpop.f32.mrb[9].mxu1  ;;  %v1335_v49 = vpop.f32.mrb[8].mxu0 }
 0xc64   : > { %v1340_v51 = vrot.slane %v1335_v49, 4  ;;  %v2527_v52 = vpop.f32.mrb[9].mxu0 }
 0xc65   : > { %2748 = vtanh.f32 %v1232_v47  ;;  %v2395_v56 = vmul.f32 -1.442695, %v1232_v47 }
 0xc66   : > { %v1342_v53 = vadd.f32 %v1340_v51, %v3250_v11 }
 0xc68   : > { %2750 = vtanh.f32 %v1342_v53  ;;  %v2398_v57 = vmul.f32 -1.442695, %v1342_v53 }
 0xc69   : > { %2752 = vpow2.f32 %v2395_v56 }
 0xc6a   : > { %2754 = vpow2.f32 %v2398_v57 }
 0xc6f   : > { %v2749_v54 = vpop.eup %2748 }
 0xc70   : > { %1244 = vrot.lane.b32.xlu1 %v2749_v54, %s2991_s12 }
 0xc72   : > { %v2751_v55 = vpop.eup %2750 }
 0xc73   : > { %1355 = vrot.lane.b32.xlu0 %v2751_v55, %s2991_s12  ;;  %v2753_v58 = vpop.eup %2752 }
 0xc74   : > { %v2755_v59 = vpop.eup %2754  ;;  %v1238_v60 = vadd.f32 1.0, %v2753_v58 }
 0xc75   : > { %v1346_v61 = vadd.f32 1.0, %v2755_v59 }
 0xc76   : > { %2756 = vrcp.f32 %v1238_v60 }
 0xc77   : > { %2758 = vrcp.f32 %v1346_v61 }
 0xc80   : > { %v2757_v62 = vpop.eup %2756 }
 0xc81   : > { %v2759_v4 = vpop.eup %2758  ;;  %v1242_v9 = vmul.f32 %v2757_v62, %v3364_v28 }
 0xc82   : > { %v1353_v14 = vmul.f32 %v2759_v4, %v1351_v10 }
 0xce2   : > { %v1245_v63 = vpop.permute.xlu1 %1244 }
 0xce3   : > { %v1247_v2 = vmul.f32 %v2757_v62, %v1245_v63 }
 0xce5   : > { %1249 = vrot.lane.b32.xlu1 %v1247_v2, %s2992_s20  ;;  %v1356_v7 = vpop.permute.xlu0 %1355 }
 0xce6   : > { %v1358_v8 = vmul.f32 %v2759_v4, %v1356_v7 }
 0xce8   : > { %1360 = vrot.lane.b32.xlu0 %v1358_v8, %s2992_s20 }
 0xd57   : > { %v1250_v12 = vpop.permute.xlu1 %1249 }
 0xd58   : > { %v3400_v13 = vadd.f32 %v1250_v12, %v1242_v9 }
 0xd5a   : > { %2760 = vtanh.f32 %v3400_v13  ;;  %v1361_v15 = vpop.permute.xlu0 %1360 }
 0xd5b   : > { %v3403_v16 = vadd.f32 %v1361_v15, %v1353_v14 }
 0xd5d   : > { %2762 = vtanh.f32 %v3403_v16  ;;  %v1569_v57 = vrot.slane %v3403_v16, 7 }
 0xd64   : > { %v2761_v17 = vpop.eup %2760 }
 0xd65   : > { %1255 = vrot.lane.b32.xlu1 %v2761_v17, %s2994_s21 }
 0xd67   : > { %v2763_v18 = vpop.eup %2762 }
 0xd68   : > { %1366 = vrot.lane.b32.xlu0 %v2763_v18, %s2994_s21 }
 0xdd7   : > { %v1256_v19 = vpop.permute.xlu1 %1255 }
 0xdd8   : > { %v3408_v20 = vmul.f32 %v2757_v62, %v1256_v19 }
 0xdda   : > { %v1374_v21 = vrot.slane %v3408_v20, 4  ;;  %v1367_v22 = vpop.permute.xlu0 %1366 }
 0xddb   : > { %v1369_v23 = vmul.f32 %v2759_v4, %v1367_v22 }
 0xddc   : > { %1375 = vrot.lane.b32.xlu0 %v1374_v21, %s2991_s12 }
 0xddd   : > { %1371 = vrot.lane.b32.xlu1 %v1369_v23, %s2995_s24  ;;  %v1482_v24 = vrot.slane %v1369_v23, 4 }
 0xde1   : > { %1483 = vrot.lane.b32.xlu1 %v1482_v24, %s2995_s24 }
 0xe4e   : > { %v1376_v25 = vpop.permute.xlu0 %1375 }
 0xe4f   : > { %v1372_v28 = vpop.permute.xlu1 %1371 }
 0xe50   : > { %v1378_v29 = vsel %vm397_vm6, %v1372_v28, %v1376_v25 }
 0xe51   : > { %v1380_v30 = vrot.slane %v1378_v29, 4 }
 0xe53   : > { %v1484_v31 = vpop.permute.xlu1 %1483  ;;  %2533 = vmatmul.mubr.msk.f32.vlgmr.msra.gmra.mrb[10].mxu1 %vm505_vm7, %v1380_v30 }
 0xe54   : > { %2538 = vmatmul.mubr.msk.f32.vlgmr.msra.gmra.mrb[10].mxu0 %vm397_vm6, %v1484_v31  ;;  %2602 = vmatpush3.bf16.msk.msra.mxu1 %vm3260_vm5, %v3258_v26 }
 0xe55   : > { %2548 = vmatpush3.msk.msra.mxu0 %vm401_vm1, %v3230_v5  ;;  %2544 = vmatprep.mubr.msk.f32.mxu1 %vm2989_vm0, %v2990_v1 }
 0xe56   : > { %2549 = vmatprep.mubr.msk.f32.mxu0 %vm2989_vm0, %v2990_v1  ;;  %2603 = vmatprep.subr.bf16.mxu1 %v2988_v0 }
 0xe57   : > { %2559 = vmatprep.subr.mxu0 %v2990_v1 }
 0xf26   : > { %v1449_v32 = vpop.f32.mrb[10].mxu1 }
 0xf27   : > { %v1450_v34 = vadd.f32 %v1449_v32, %v3287_v33  ;;  %v2534_v35 = vpop.f32.mrb[11].mxu1  ;;  %v1553_v37 = vpop.f32.mrb[10].mxu0 }
 0xf28   : > { %v1558_v38 = vrot.slane %v1553_v37, 3  ;;  %v2539_v39 = vpop.f32.mrb[11].mxu0 }
 0xf29   : > { %2764 = vtanh.f32 %v1450_v34  ;;  %v2401_v43 = vmul.f32 -1.442695, %v1450_v34 }
 0xf2a   : > { %v1560_v40 = vadd.f32 %v1558_v38, %v3250_v11 }
 0xf2c   : > { %2766 = vtanh.f32 %v1560_v40  ;;  %v2404_v44 = vmul.f32 -1.442695, %v1560_v40 }
 0xf2d   : > { %2768 = vpow2.f32 %v2401_v43 }
 0xf2e   : > { %2770 = vpow2.f32 %v2404_v44 }
 0xf33   : > { %v2765_v41 = vpop.eup %2764 }
 0xf34   : > { %1462 = vrot.lane.b32.xlu0 %v2765_v41, %s2991_s12 }
 0xf36   : > { %v2767_v42 = vpop.eup %2766 }
 0xf37   : > { %1573 = vrot.lane.b32.xlu1 %v2767_v42, %s2991_s12  ;;  %v2769_v45 = vpop.eup %2768 }
 0xf38   : > { %v2771_v46 = vpop.eup %2770  ;;  %v1456_v47 = vadd.f32 1.0, %v2769_v45 }
 0xf39   : > { %v1564_v48 = vadd.f32 1.0, %v2771_v46 }
 0xf3a   : > { %2772 = vrcp.f32 %v1456_v47 }
 0xf3b   : > { %2774 = vrcp.f32 %v1564_v48 }
 0xf44   : > { %v2773_v49 = vpop.eup %2772 }
 0xf45   : > { %v2775_v53 = vpop.eup %2774  ;;  %v1460_v56 = vmul.f32 %v2773_v49, %v3400_v13 }
 0xf46   : > { %v1571_v60 = vmul.f32 %v2775_v53, %v1569_v57 }
 0xfa6   : > { %v1463_v51 = vpop.permute.xlu0 %1462 }
 0xfa7   : > { %v1465_v52 = vmul.f32 %v2773_v49, %v1463_v51 }
 0xfa9   : > { %1467 = vrot.lane.b32.xlu0 %v1465_v52, %s2992_s20  ;;  %v1574_v54 = vpop.permute.xlu1 %1573 }
 0xfaa   : > { %v1576_v55 = vmul.f32 %v2775_v53, %v1574_v54 }
 0xfac   : > { %1578 = vrot.lane.b32.xlu1 %v1576_v55, %s2992_s20 }
0x101b   : > { %v1468_v58 = vpop.permute.xlu0 %1467 }
0x101c   : > { %v3436_v59 = vadd.f32 %v1468_v58, %v1460_v56 }
0x101e   : > { %2776 = vtanh.f32 %v3436_v59  ;;  %v1579_v61 = vpop.permute.xlu1 %1578 }
0x101f   : > { %v3439_v62 = vadd.f32 %v1579_v61, %v1571_v60 }
0x1021   : > { %2778 = vtanh.f32 %v3439_v62  ;;  %v1787_v43 = vrot.slane %v3439_v62, 7 }
0x1028   : > { %v2777_v63 = vpop.eup %2776 }
0x1029   : > { %1473 = vrot.lane.b32.xlu0 %v2777_v63, %s2994_s21 }
0x102b   : > { %v2779_v2 = vpop.eup %2778 }
0x102c   : > { %1584 = vrot.lane.b32.xlu1 %v2779_v2, %s2994_s21 }
0x109b   : > { %v1474_v4 = vpop.permute.xlu0 %1473 }
0x109c   : > { %v3444_v7 = vmul.f32 %v2773_v49, %v1474_v4 }
0x109e   : > { %v1592_v8 = vrot.slane %v3444_v7, 3  ;;  %v1585_v9 = vpop.permute.xlu1 %1584 }
0x109f   : > { %v1587_v10 = vmul.f32 %v2775_v53, %v1585_v9 }
0x10a0   : > { %1593 = vrot.lane.b32.xlu1 %v1592_v8, %s2991_s12 }
0x10a1   : > { %1589 = vrot.lane.b32.xlu0 %v1587_v10, %s2995_s24  ;;  %v1700_v12 = vrot.slane %v1587_v10, 5 }
0x10a5   : > { %1701 = vrot.lane.b32.xlu0 %v1700_v12, %s2995_s24 }
0x1112   : > { %v1594_v13 = vpop.permute.xlu1 %1593 }
0x1113   : > { %v1590_v14 = vpop.permute.xlu0 %1589 }
0x1114   : > { %v1596_v15 = vsel %vm397_vm6, %v1590_v14, %v1594_v13 }
0x1115   : > { %v1598_v16 = vrot.slane %v1596_v15, 5 }
0x1117   : > { %v1702_v17 = vpop.permute.xlu0 %1701  ;;  %2545 = vmatmul.mubr.msk.f32.vlgmr.msra.gmra.mrb[12].mxu1 %vm505_vm7, %v1598_v16 }
0x1118   : > { %2550 = vmatmul.mubr.msk.f32.vlgmr.msra.gmra.mrb[12].mxu0 %vm397_vm6, %v1702_v17  ;;  %2606 = vmatpush3.bf16.msk.msra.mxu1 %vm3260_vm5, %v3258_v26 }
0x1119   : > { %2560 = vmatpush3.msk.msra.mxu0 %vm401_vm1, %v3230_v5  ;;  %2556 = vmatprep.mubr.msk.f32.mxu1 %vm2989_vm0, %v2990_v1 }
0x111a   : > { %2561 = vmatprep.mubr.msk.f32.mxu0 %vm2989_vm0, %v2990_v1  ;;  %2607 = vmatprep.subr.bf16.mxu1 %v2988_v0 }
0x111b   : > { %2571 = vmatprep.subr.mxu0 %v2990_v1 }
0x11ea   : > { %v1667_v18 = vpop.f32.mrb[12].mxu1 }
0x11eb   : > { %v1668_v19 = vadd.f32 %v1667_v18, %v3287_v33  ;;  %v2546_v21 = vpop.f32.mrb[13].mxu1  ;;  %v1771_v22 = vpop.f32.mrb[12].mxu0 }
0x11ec   : > { %v1776_v23 = vrot.slane %v1771_v22, 2  ;;  %v2551_v24 = vpop.f32.mrb[13].mxu0 }
0x11ed   : > { %2780 = vtanh.f32 %v1668_v19  ;;  %v2407_v0 = vmul.f32 -1.442695, %v1668_v19 }
0x11ee   : > { %v1778_v5 = vadd.f32 %v1776_v23, %v3250_v11 }
0x11f0   : > { %2782 = vtanh.f32 %v1778_v5  ;;  %v2410_v29 = vmul.f32 -1.442695, %v1778_v5 }
0x11f1   : > { %2784 = vpow2.f32 %v2407_v0 }
0x11f2   : > { %2786 = vpow2.f32 %v2410_v29 }
0x11f7   : > { %v2781_v25 = vpop.eup %2780 }
0x11f8   : > { %1680 = vrot.lane.b32.xlu1 %v2781_v25, %s2991_s12 }
0x11fa   : > { %v2783_v28 = vpop.eup %2782 }
0x11fb   : > { %1791 = vrot.lane.b32.xlu0 %v2783_v28, %s2991_s12  ;;  %v2785_v30 = vpop.eup %2784 }
0x11fc   : > { %v2787_v31 = vpop.eup %2786  ;;  %v1674_v32 = vadd.f32 1.0, %v2785_v30 }
0x11fd   : > { %v1782_v34 = vadd.f32 1.0, %v2787_v31 }
0x11fe   : > { %2788 = vrcp.f32 %v1674_v32 }
0x11ff   : > { %2790 = vrcp.f32 %v1782_v34 }
0x1208   : > { %v2789_v35 = vpop.eup %2788 }
0x1209   : > { %v2791_v39 = vpop.eup %2790  ;;  %v1678_v42 = vmul.f32 %v2789_v35, %v3436_v59 }
0x120a   : > { %v1789_v46 = vmul.f32 %v2791_v39, %v1787_v43 }
0x126a   : > { %v1681_v37 = vpop.permute.xlu1 %1680 }
0x126b   : > { %v1683_v38 = vmul.f32 %v2789_v35, %v1681_v37 }
0x126d   : > { %1685 = vrot.lane.b32.xlu1 %v1683_v38, %s2992_s20  ;;  %v1792_v40 = vpop.permute.xlu0 %1791 }
0x126e   : > { %v1794_v41 = vmul.f32 %v2791_v39, %v1792_v40 }
0x1270   : > { %1796 = vrot.lane.b32.xlu0 %v1794_v41, %s2992_s20 }
0x12df   : > { %v1686_v44 = vpop.permute.xlu1 %1685 }
0x12e0   : > { %v1688_v45 = vadd.f32 %v1686_v44, %v1678_v42 }
0x12e2   : > { %2792 = vtanh.f32 %v1688_v45  ;;  %v1797_v47 = vpop.permute.xlu0 %1796 }
0x12e3   : > { %v1799_v48 = vadd.f32 %v1797_v47, %v1789_v46 }
0x12e5   : > { %2794 = vtanh.f32 %v1799_v48  ;;  %v2005_v24 = vrot.slane %v1799_v48, 7 }
0x12ec   : > { %v2793_v49 = vpop.eup %2792 }
0x12ed   : > { %1691 = vrot.lane.b32.xlu1 %v2793_v49, %s2994_s21 }
0x12ef   : > { %v2795_v51 = vpop.eup %2794 }
0x12f0   : > { %1802 = vrot.lane.b32.xlu0 %v2795_v51, %s2994_s21 }
0x135f   : > { %v1692_v52 = vpop.permute.xlu1 %1691 }
0x1360   : > { %v3474_v53 = vmul.f32 %v2789_v35, %v1692_v52 }
0x1362   : > { %v1810_v54 = vrot.slane %v3474_v53, 2  ;;  %v1803_v55 = vpop.permute.xlu0 %1802 }
0x1363   : > { %v1805_v56 = vmul.f32 %v2791_v39, %v1803_v55 }
0x1364   : > { %1811 = vrot.lane.b32.xlu0 %v1810_v54, %s2991_s12 }
0x1365   : > { %1807 = vrot.lane.b32.xlu1 %v1805_v56, %s2995_s24  ;;  %v1918_v57 = vrot.slane %v1805_v56, 6 }
0x1369   : > { %1919 = vrot.lane.b32.xlu1 %v1918_v57, %s2995_s24 }
0x13d6   : > { %v1812_v58 = vpop.permute.xlu0 %1811 }
0x13d7   : > { %v1808_v59 = vpop.permute.xlu1 %1807 }
0x13d8   : > { %v1814_v60 = vsel %vm397_vm6, %v1808_v59, %v1812_v58 }
0x13d9   : > { %v1816_v61 = vrot.slane %v1814_v60, 6 }
0x13db   : > { %v1920_v62 = vpop.permute.xlu1 %1919  ;;  %2557 = vmatmul.mubr.msk.f32.vlgmr.msra.gmra.mrb[14].mxu1 %vm505_vm7, %v1816_v61 }
0x13dc   : > { %2562 = vmatmul.mubr.msk.f32.vlgmr.msra.gmra.mrb[14].mxu0 %vm397_vm6, %v1920_v62  ;;  %2610 = vmatpush3.bf16.msk.msra.mxu1 %vm3260_vm5, %v3258_v26 }
0x13dd   : > { %2568 = vmatprep.mubr.msk.f32.mxu1 %vm2989_vm0, %v2990_v1  ;;  %2572 = vmatpush3.msra.mxu0 %v3234_v6 }
0x13de   : > { %2573 = vmatprep.mubr.msk.f32.mxu0 %vm2989_vm0, %v2990_v1 }
0x14ae   : > { %v1885_v63 = vpop.f32.mrb[14].mxu1 }
0x14af   : > { %v1886_v2 = vadd.f32 %v1885_v63, %v3287_v33  ;;  %v2558_v4 = vpop.f32.mrb[15].mxu1  ;;  %v1989_v8 = vpop.f32.mrb[14].mxu0 }
0x14b0   : > { %v1994_v9 = vrot.slane %v1989_v8, 1  ;;  %v2563_v10 = vpop.f32.mrb[15].mxu0 }
0x14b1   : > { %2796 = vtanh.f32 %v1886_v2  ;;  %v2413_v6 = vmul.f32 -1.442695, %v1886_v2 }
0x14b2   : > { %v1996_v12 = vadd.f32 %v1994_v9, %v3250_v11 }
0x14b4   : > { %2798 = vtanh.f32 %v1996_v12  ;;  %v2416_v13 = vmul.f32 -1.442695, %v1996_v12 }
0x14b5   : > { %2800 = vpow2.f32 %v2413_v6 }
0x14b6   : > { %2802 = vpow2.f32 %v2416_v13 }
0x14bb   : > { %v2797_v26 = vpop.eup %2796 }
0x14bc   : > { %1898 = vrot.lane.b32.xlu0 %v2797_v26, %s2991_s12 }
0x14be   : > { %v2799_v27 = vpop.eup %2798 }
0x14bf   : > { %2009 = vrot.lane.b32.xlu1 %v2799_v27, %s2991_s12  ;;  %v2801_v1 = vpop.eup %2800 }
0x14c0   : > { %v2803_v14 = vpop.eup %2802  ;;  %v1892_v15 = vadd.f32 1.0, %v2801_v1 }
0x14c1   : > { %v2000_v16 = vadd.f32 1.0, %v2803_v14 }
0x14c2   : > { %2804 = vrcp.f32 %v1892_v15 }
0x14c3   : > { %2806 = vrcp.f32 %v2000_v16 }
0x14cc   : > { %v2805_v17 = vpop.eup %2804 }
0x14cd   : > { %v2807_v19 = vpop.eup %2806  ;;  %v1896_v23 = vmul.f32 %v2805_v17, %v1688_v45 }
0x14ce   : > { %v2007_v28 = vmul.f32 %v2807_v19, %v2005_v24 }
0x152e   : > { %v1899_v18 = vpop.permute.xlu0 %1898 }
0x152f   : > { %v1901_v11 = vmul.f32 %v2805_v17, %v1899_v18 }
0x1531   : > { %1903 = vrot.lane.b32.xlu0 %v1901_v11, %s2992_s20  ;;  %v2010_v21 = vpop.permute.xlu1 %2009 }
0x1532   : > { %v2012_v22 = vmul.f32 %v2807_v19, %v2010_v21 }
0x1534   : > { %2014 = vrot.lane.b32.xlu1 %v2012_v22, %s2992_s20 }
0x15a3   : > { %v1904_v5 = vpop.permute.xlu0 %1903 }
0x15a4   : > { %v1906_v25 = vadd.f32 %v1904_v5, %v1896_v23 }
0x15a6   : > { %2808 = vtanh.f32 %v1906_v25  ;;  %v2015_v0 = vpop.permute.xlu1 %2014 }
0x15a7   : > { %v2017_v29 = vadd.f32 %v2015_v0, %v2007_v28 }
0x15a9   : > { %2810 = vtanh.f32 %v2017_v29 }
0x15b0   : > { %v2809_v30 = vpop.eup %2808 }
0x15b1   : > { %1909 = vrot.lane.b32.xlu0 %v2809_v30, %s2994_s21 }
0x15b3   : > { %v2811_v31 = vpop.eup %2810 }
0x15b4   : > { %2020 = vrot.lane.b32.xlu1 %v2811_v31, %s2994_s21 }
0x1623   : > { %v1910_v32 = vpop.permute.xlu0 %1909 }
0x1624   : > { %v1912_v34 = vmul.f32 %v2805_v17, %v1910_v32 }
0x1626   : > { %v2028_v35 = vrot.slane %v1912_v34, 1  ;;  %v2021_v37 = vpop.permute.xlu1 %2020 }
0x1627   : > { %v2023_v38 = vmul.f32 %v2807_v19, %v2021_v37 }
0x1628   : > { %2029 = vrot.lane.b32.xlu1 %v2028_v35, %s2991_s12 }
0x1629   : > { %2025 = vrot.lane.b32.xlu0 %v2023_v38, %s2995_s24 }
0x169a   : > { %v2030_v39 = vpop.permute.xlu1 %2029 }
0x169b   : > { %v2026_v40 = vpop.permute.xlu0 %2025 }
0x169c   : > { %v2032_v41 = vsel %vm397_vm6, %v2026_v40, %v2030_v39 }
0x169d   : > { %v2034_v42 = vrot.slane %v2032_v41, 7 }
0x169f   : > { %2569 = vmatmul.mubr.msk.f32.vlgmr.msra.gmra.mrb[16].mxu1 %vm505_vm7, %v2034_v42 }
0x1772   : > { %v2103_v43 = vpop.f32.mrb[16].mxu1 }
0x1773   : > { %v2104_v44 = vadd.f32 %v2103_v43, %v3287_v33  ;;  %v2570_v45 = vpop.f32.mrb[17].mxu1 }
0x1775   : > { %2812 = vtanh.f32 %v2104_v44  ;;  %v2419_v47 = vmul.f32 -1.442695, %v2104_v44 }
0x1777   : > { %2814 = vpow2.f32 %v2419_v47 }
0x177f   : > { %v2813_v46 = vpop.eup %2812 }
0x1780   : > { %2116 = vrot.lane.b32.xlu0 %v2813_v46, %s2991_s12 }
0x1781   : > { %v2815_v48 = vpop.eup %2814 }
0x1782   : > { %v2110_v49 = vadd.f32 1.0, %v2815_v48 }
0x1784   : > { %2816 = vrcp.f32 %v2110_v49 }
0x178e   : > { %v2817_v51 = vpop.eup %2816 }
0x178f   : > { %v2114_v33 = vmul.f32 %v2817_v51, %v1906_v25 }
0x17f2   : > { %v2117_v52 = vpop.permute.xlu0 %2116 }
0x17f3   : > { %v2119_v54 = vmul.f32 %v2817_v51, %v2117_v52 }
0x17f5   : > { %2121 = vrot.lane.b32.xlu1 %v2119_v54, %s2992_s20 }
0x17f9   : > { %608 = vrot.lane.b32.xlu1 %v3301_v3, %s2995_s24 }
0x17fd   : > { %1042 = vrot.lane.b32.xlu1 %v3372_v36, %s2995_s24 }
0x1801   : > { %1478 = vrot.lane.b32.xlu1 %v3444_v7, %s2995_s24 }
0x1805   : > { %1914 = vrot.lane.b32.xlu1 %v1912_v34, %s2995_s24 }
0x1867   : > { %v2122_v55 = vpop.permute.xlu1 %2121 }
0x1868   : > { %v2124_v56 = vadd.f32 %v2122_v55, %v2114_v33 }
0x186a   : > { %2818 = vtanh.f32 %v2124_v56 }
0x186b   : > { %v609_v57 = vpop.permute.xlu1 %608 }
0x186c   : > { %612 = vst.msk [vmem:[#allocation2] sm:$0x1] %vm611_vm8, %v609_v57 }
0x186f   : > { %v1043_v58 = vpop.permute.xlu1 %1042 }
0x1870   : > { %1045 = vst.msk [vmem:[#allocation2 + $0x2] sm:$0x1] %vm611_vm8, %v1043_v58 }
0x1873   : > { %v1479_v3 = vpop.permute.xlu1 %1478 }
0x1874   : > { %v2819_v59 = vpop.eup %2818  ;;  %1481 = vst.msk [vmem:[#allocation2 + $0x4] sm:$0x1] %vm611_vm8, %v1479_v3 }
0x1875   : > { %2127 = vrot.lane.b32.xlu0 %v2819_v59, %s2994_s21 }
0x1877   : > { %v1915_v36 = vpop.permute.xlu1 %1914 }
0x1878   : > { %1917 = vst.msk [vmem:[#allocation2 + $0x6] sm:$0x1] %vm611_vm8, %v1915_v36 }
0x1879   : > { %824 = vrot.lane.b32.xlu0 %v3336_v50, %s2995_s24 }
0x187d   : > { %1260 = vrot.lane.b32.xlu0 %v3408_v20, %s2995_s24 }
0x1881   : > { %1696 = vrot.lane.b32.xlu0 %v3474_v53, %s2995_s24 }
0x18e7   : > { %v2128_v7 = vpop.permute.xlu0 %2127 }
0x18e8   : > { %v2130_v60 = vmul.f32 %v2817_v51, %v2128_v7 }
0x18ea   : > { %2132 = vrot.lane.b32.xlu0 %v2130_v60, %s2995_s24 }
0x18eb   : > { %v825_v61 = vpop.permute.xlu0 %824 }
0x18ec   : > { %827 = vst.msk [vmem:[#allocation2 + $0x1] sm:$0x1] %vm611_vm8, %v825_v61 }
0x18ef   : > { %v1261_v62 = vpop.permute.xlu0 %1260 }
0x18f0   : > { %1263 = vst.msk [vmem:[#allocation2 + $0x3] sm:$0x1] %vm611_vm8, %v1261_v62 }
0x18f3   : > { %v1697_v63 = vpop.permute.xlu0 %1696 }
0x18f4   : > { %1699 = vst.msk [vmem:[#allocation2 + $0x5] sm:$0x1] %vm611_vm8, %v1697_v63 }
0x195c   : > { %v2133_v50 = vpop.permute.xlu0 %2132 }
0x195d   : > { %2135 = vst.msk [vmem:[#allocation2 + $0x7] sm:$0x1] %vm611_vm8, %v2133_v50 }
0x1964   : > { %v2136_v20 = vld [vmem:[#allocation2] sm:$0xff] }
0x1965   : > { %v2137_v2 = vsel %vm397_vm6, %v2136_v20, -inf }
0x1966   : > { %2138 = vmax.xlane.f32.xlu1 %v2137_v2 }
0x19f3   : > { %v2139_v53 = vpop.xlane.xlu1 %2138 }
0x19f4   : > { %v2140_v4 = vsub.f32 %v2136_v20, %v2139_v53 }
0x19f6   : > { %v2141_v8 = vmul.f32 1.442695, %v2140_v4 }
0x19f8   : > { %2820 = vpow2.f32 %v2141_v8 }
0x1a02   : > { %v2821_v9 = vpop.eup %2820 }
0x1a03   : > { %v2143_v10 = vsel %vm397_vm6, %v2821_v9, 0.0 }
0x1a04   : > { %2144 = vadd.xlane.f32.xlu0 %v2143_v10 }
0x1a91   : > { %v2145_v12 = vpop.xlane.xlu0 %2144 }
0x1a92   : > { %2822 = vrcp.f32 %v2145_v12 }
0x1a9c   : > { %v2823_v26 = vpop.eup %2822 }
0x1a9d   : > { %v2147_v27 = vmul.f32 %v2823_v26, %v2145_v12 }
0x1a9f   : > { %v2148_v6 = vsub.f32 2.0, %v2147_v27 }
0x1aa1   : > { %v2149_v13 = vmul.f32 %v2823_v26, %v2148_v6 }
0x1aa3   : > { %v2150_v1 = vmul.f32 %v2821_v9, %v2149_v13 }
0x1aa5   : > { %2152 = vrot.lane.b32.xlu0 %v2150_v1, %s2996_s8 }
0x1b17   : > { %v2153_v14 = vpop.permute.xlu0 %2152 }
0x1b18   : > { %2155 = vxpose.xlu1.b32.start.end [1/1] (short) (narrow) %v2153_v14, 8 }
0x1b98   : > { %v2171_v15 = vpop.trf.xlu1 }
0x1b99   : > { %2574 = vmatmul.mubr.msk.f32.vlgmr.msra.gmra.mrb[16].mxu0 %vm2187_vm9, %v2171_v15 }
0x1c6c   : > { %v2257_v16 = vpop.f32.mrb[16].mxu0 }
0x1c6d   : > { %2262 = vst.msk [vmem:[%s308_s19] sm:$0x3f] %vm2261_vm10, %v2257_v16  ;;  %v2575_v17 = vpop.f32.mrb[17].mxu0 }
0x1c6e PF: > { %p18_p9 = scmp.ge.s32.totalorder %s3159_s16, 4   ;;  %s3572_s21 = smov %s2972_s22 }
0x1c6f   : > { %s3573_s22 = smov %s2976_s23  ;;  %s3574_s23 = smov %s3169_s18 }
0x1c70   : > { %s3575_s24 = smov %s3159_s16  ;;  %20 = sbr.rel (!%p18_p9) target bundleno = 5 (0x5), region = 96 }
0x1c77   :  { %2282 = vsyncpa [#allocation4], 1 }
0x1c78   :  { %2284 = vsyncpa [#allocation4 + $0x1], 1 }
0x1c79   :  { %2285 = vsyncpa [#allocation6], 1 }
0x1c7a   :  { %2286 = vsyncpa [#allocation9], 1 }

</bundles_post_ra>
